<compile_context>
chip_gen: v6e
topology: v6e:2x2x1
jax: 0.10.0
libtpu: 0.0.40
codegen_flags: <defaults>
</compile_context>

<pallas_src>
import functools
import math

import numpy as np
import jax
import jax.numpy as jnp
from jax import lax
from jax.experimental import pallas as pl
from jax.experimental.pallas import tpu as pltpu

# Selection-critical matmuls (q/k proj, correlation) vs. magnitude-only matmuls
# (v proj, aggregation, output proj).  See header comment.
_PREC_SELECT = lax.Precision.HIGHEST
_PREC_VALUE = lax.Precision.DEFAULT


def _skew_rows(x, sign):
    """Circularly roll row i of a square [N, N] tile by sign*i along lanes.

    log2(N)-stage barrel shifter built only from static jnp.roll (slice+concat)
    and selects, so it lowers on every TPU generation.  One call replaces the
    previous O(N) per-delay roll/reduce loops.
    """
    n = x.shape[0]
    assert x.shape[0] == x.shape[1], "skew expects a square tile"
    row = lax.broadcasted_iota(jnp.int32, x.shape, 0)
    y = x
    shift = 1
    while shift < n:
        rolled = jnp.roll(y, sign * shift, axis=1)
        y = jnp.where((row & shift) != 0, rolled, y)
        shift *= 2
    return y


def _autocorr_layer_kernel(
    q_ref, k_ref, v_ref,
    wq_ref, bq_ref, wk_ref, bk_ref, wv_ref, bv_ref,
    wo_ref, bo_ref,
    o_ref,
    *, L, S, HE_K, HE_V, top_k, BB,
):
    f32 = jnp.float32

    # ---- batched Q/K/V projections: one slab matmul per weight (MXU) --------
    q_slab = jnp.concatenate([q_ref[b] for b in range(BB)], axis=0)    # [BB*L, D]
    k_slab = jnp.concatenate([k_ref[b] for b in range(BB)], axis=0)    # [BB*S, D]
    v_slab = jnp.concatenate([v_ref[b] for b in range(BB)], axis=0)    # [BB*S, D]

    qp = jnp.dot(q_slab, wq_ref[...], precision=_PREC_SELECT,
                 preferred_element_type=f32) + bq_ref[...]             # [BB*L, HE_K]
    kp = jnp.dot(k_slab, wk_ref[...], precision=_PREC_SELECT,
                 preferred_element_type=f32) + bk_ref[...]             # [BB*S, HE_K]
    vp = jnp.dot(v_slab, wv_ref[...], precision=_PREC_VALUE,
                 preferred_element_type=f32) + bv_ref[...]             # [BB*S, HE_V]

    rows_i = lax.broadcasted_iota(jnp.int32, (L, L), 0)
    cols_i = lax.broadcasted_iota(jnp.int32, (L, L), 1)
    eye = rows_i == cols_i
    inv_he = f32(1.0 / HE_K)

    aggs = []
    # NOTE: BB is a small static batch chunk (<= 8); for large BB this loop
    # should become lax.fori_loop(..., unroll=True) over VMEM scratch slabs.
    for b in range(BB):
        q2 = qp[b * L:(b + 1) * L, :]                                   # [L, HE_K]
        k_b = kp[b * S:(b + 1) * S, :]                                  # [S, HE_K]
        v_b = vp[b * S:(b + 1) * S, :]                                  # [S, HE_V]
        # align key/value length to L (zero-pad or truncate), as in AutoCorrelation
        if L > S:
            k2 = jnp.concatenate([k_b, jnp.zeros((L - S, HE_K), f32)], axis=0)
            v2 = jnp.concatenate([v_b, jnp.zeros((L - S, HE_V), f32)], axis=0)
        else:
            k2 = k_b[:L, :]
            v2 = v_b[:L, :]

        # ---- period-based dependency discovery on the MXU --------------------
        # C[t, u] = k2[t] . q2[u];  corr[tau] = sum_t q2[(t+tau)%L] . k2[t]
        # = column sum of C after rolling row t LEFT by t (skew), then / (H*E).
        # (mathematically identical to irfft(rfft(q)*conj(rfft(k))) averaged
        #  over heads and channels)
        c_kq = lax.dot_general(k2, q2, (((1,), (1,)), ((), ())),
                               precision=_PREC_SELECT,
                               preferred_element_type=f32)              # [L, L]
        corr_row = jnp.sum(_skew_rows(c_kq, -1), axis=0, keepdims=True) * inv_he
        # exact [L, 1] copy of corr (masked reduce; avoids an XLU transpose)
        corr_col = jnp.sum(
            jnp.where(eye, jnp.broadcast_to(corr_row, (L, L)), f32(0.0)),
            axis=1, keepdims=True)                                      # [L, 1]

        # ---- top-k delay selection via ranks (ties -> earliest index, as top_k)
        greater = (corr_col > corr_row).astype(jnp.int32)   # [d', d]: corr[d'] > corr[d]
        eq_earlier = ((corr_col == corr_row) & (rows_i < cols_i)).astype(jnp.int32)
        rank = jnp.sum(greater + eq_earlier, axis=0, keepdims=True)     # [1, L]
        selected = rank < top_k                                         # [1, L]

        # ---- softmax over the selected correlation values ---------------------
        gmax = jnp.max(corr_row, axis=1, keepdims=True)                 # [1, 1]
        e = jnp.where(selected, jnp.exp(corr_row - gmax), f32(0.0))     # [1, L]
        coef = e / jnp.sum(e, axis=1, keepdims=True)                    # [1, L]

        # ---- time-delay aggregation as a circulant matmul on the MXU ----------
        # M[t, s] = coef[(s-t) % L]  =>  (M @ v2)[t] = sum_d coef[d] * v2[(t+d)%L]
        m_circ = _skew_rows(jnp.broadcast_to(coef, (L, L)), +1)         # [L, L]
        aggs.append(jnp.dot(m_circ, v2, precision=_PREC_VALUE,
                            preferred_element_type=f32))                # [L, HE_V]

    agg_slab = jnp.concatenate(aggs, axis=0) if BB > 1 else aggs[0]     # [BB*L, HE_V]

    # ---- output projection on the full slab ----------------------------------
    out_slab = jnp.dot(agg_slab, wo_ref[...], precision=_PREC_VALUE,
                       preferred_element_type=f32) + bo_ref[...]        # [BB*L, D]
    for b in range(BB):
        o_ref[b] = out_slab[b * L:(b + 1) * L, :]


def auto_correlation_layer(queries, keys, values, params, *, n_heads, factor=1,
                           block_b=None):
    """Pallas implementation of AutoCorrelationLayer.forward (eval / inference path)."""
    B, L, d_model = queries.shape
    _, S, _ = keys.shape
    HE_K = params["wq"].shape[1]          # d_keys * n_heads
    HE_V = params["wv"].shape[1]          # d_values * n_heads
    # guard: int(factor*log(L)) == 0 for very short sequences would NaN the softmax
    top_k = max(1, min(L, int(factor * math.log(L))))

    if block_b is None:
        block_b = 1
        for cand in range(min(B, 8), 0, -1):
            if B % cand == 0:
                block_b = cand
                break
    assert B % block_b == 0, "block_b must divide the batch size"

    kernel = functools.partial(
        _autocorr_layer_kernel,
        L=L, S=S, HE_K=HE_K, HE_V=HE_V, top_k=top_k, BB=block_b)

    # advisory cost estimate so XLA schedules the custom call sensibly
    flops = 2 * B * (L * d_model * HE_K + S * d_model * HE_K + S * d_model * HE_V
                     + L * L * HE_K + L * L * HE_V + L * HE_V * d_model)
    bytes_accessed = 4 * (2 * B * L * d_model + 2 * B * S * d_model
                          + 2 * d_model * HE_K + 2 * d_model * HE_V
                          + 2 * HE_K + HE_V + d_model)
    cost = pl.CostEstimate(flops=flops, transcendentals=B * L,
                           bytes_accessed=bytes_accessed)

    full2 = lambda i: (0, 0)
    out = pl.pallas_call(
        kernel,
        out_shape=jax.ShapeDtypeStruct((B, L, d_model), jnp.float32),
        grid=(B // block_b,),
        in_specs=[
            pl.BlockSpec((block_b, L, d_model), lambda i: (i, 0, 0)),   # queries
            pl.BlockSpec((block_b, S, d_model), lambda i: (i, 0, 0)),   # keys
            pl.BlockSpec((block_b, S, d_model), lambda i: (i, 0, 0)),   # values
            pl.BlockSpec((d_model, HE_K), full2),                       # Wq
            pl.BlockSpec((1, HE_K), full2),                             # bq
            pl.BlockSpec((d_model, HE_K), full2),                       # Wk
            pl.BlockSpec((1, HE_K), full2),                             # bk
            pl.BlockSpec((d_model, HE_V), full2),                       # Wv
            pl.BlockSpec((1, HE_V), full2),                             # bv
            pl.BlockSpec((HE_V, d_model), full2),                       # Wo
            pl.BlockSpec((1, d_model), full2),                          # bo
        ],
        out_specs=pl.BlockSpec((block_b, L, d_model), lambda i: (i, 0, 0)),
        compiler_params=pltpu.CompilerParams(dimension_semantics=("parallel",)),
        cost_estimate=cost,
    )(queries, keys, values,
      params["wq"], params["bq"], params["wk"], params["bk"],
      params["wv"], params["bv"], params["wo"], params["bo"])
    # output_attention=False in the wrapped AutoCorrelation -> attn is None
    return out, None


# ---------------------------------------------------------------------------
# Deterministic parameter init (PyTorch nn.Linear-style uniform(-1/sqrt(fan_in)))
# ---------------------------------------------------------------------------
def init_params(key, d_model, n_heads, d_keys=None, d_values=None):
    d_keys = d_keys or d_model // n_heads
    d_values = d_values or d_model // n_heads
    HE_k = d_keys * n_heads
    HE_v = d_values * n_heads
    ks = jax.random.split(key, 8)

    def linear(kw, kb, fan_in, fan_out):
        bound = 1.0 / math.sqrt(fan_in)
        w = jax.random.uniform(kw, (fan_in, fan_out), jnp.float32, -bound, bound)
        b = jax.random.uniform(kb, (1, fan_out), jnp.float32, -bound, bound)
        return w, b

    wq, bq = linear(ks[0], ks[1], d_model, HE_k)
    wk, bk = linear(ks[2], ks[3], d_model, HE_k)
    wv, bv = linear(ks[4], ks[5], d_model, HE_v)
    wo, bo = linear(ks[6], ks[7], HE_v, d_model)
    return dict(wq=wq, bq=bq, wk=wk, bk=bk, wv=wv, bv=bv, wo=wo, bo=bo)


# ---------------------------------------------------------------------------
# Pure-JAX reference (mirrors PyTorch AutoCorrelationLayer + AutoCorrelation,
# eval mode; circular correlation == irfft(rfft(q)*conj(rfft(k))))
# ---------------------------------------------------------------------------
def reference(queries, keys, values, params, *, n_heads, factor=1):
    B, L, d_model = queries.shape
    _, S, _ = keys.shape
    HE = params["wq"].shape[1]
    E = HE // n_heads

    dot = lambda a, b: jnp.matmul(a, b, precision=lax.Precision.HIGHEST)
    q = (dot(queries, params["wq"]) + params["bq"]).reshape(B, L, n_heads, E)
    k = (dot(keys, params["wk"]) + params["bk"]).reshape(B, S, n_heads, E)
    v = (dot(values, params["wv"]) + params["bv"]).reshape(B, S, n_heads, E)

    if L > S:
        pad = jnp.zeros((B, L - S, n_heads, E), q.dtype)
        k = jnp.concatenate([k, pad], axis=1)
        v = jnp.concatenate([v, pad], axis=1)
    else:
        k = k[:, :L]
        v = v[:, :L]

    qp = jnp.transpose(q, (0, 2, 3, 1))   # [B, H, E, L]
    kp = jnp.transpose(k, (0, 2, 3, 1))
    vp = jnp.transpose(v, (0, 2, 3, 1))

    # circular cross-correlation along time (== FFT formulation)
    corr = jnp.stack(
        [jnp.sum(jnp.roll(qp, -tau, axis=-1) * kp, axis=-1) for tau in range(L)],
        axis=-1)                                                     # [B, H, E, L]

    top_k = int(factor * math.log(L))
    mean_value = jnp.mean(jnp.mean(corr, axis=1), axis=1)            # [B, L]
    weights, delay = lax.top_k(mean_value, top_k)                    # [B, k]
    tmp_corr = jax.nn.softmax(weights, axis=-1)

    init_index = jnp.arange(L)
    agg = jnp.zeros_like(vp)
    for i in range(top_k):
        idx = (init_index[None, :] + delay[:, i][:, None]) % L       # [B, L]
        pattern = jnp.take_along_axis(vp, idx[:, None, None, :], axis=-1)
        agg = agg + pattern * tmp_corr[:, i][:, None, None, None]

    V = jnp.transpose(agg, (0, 3, 1, 2)).reshape(B, L, HE)
    out = dot(V, params["wo"]) + params["bo"]
    return out


if __name__ == "__main__":
    key = jax.random.PRNGKey(0)
    B, L, S, d_model, n_heads = 2, 8, 8, 32, 4

    kq, kk, kv, kp = jax.random.split(key, 4)
    queries = jax.random.normal(kq, (B, L, d_model), jnp.float32)
    keys_in = jax.random.normal(kk, (B, S, d_model), jnp.float32)
    values_in = jax.random.normal(kv, (B, S, d_model), jnp.float32)
    params = init_params(kp, d_model, n_heads)

    out, attn = auto_correlation_layer(queries, keys_in, values_in, params,
                                       n_heads=n_heads, factor=1)
    out = jax.block_until_ready(out)

    ref = reference(queries, keys_in, values_in, params, n_heads=n_heads, factor=1)
    # value path runs at DEFAULT (bf16 MXU) precision -> compare at 1e-2
    np.testing.assert_allclose(np.asarray(out), np.asarray(ref), rtol=1e-2, atol=1e-2)

    # TODO(synk): training-path time_delay_agg and output_attention=True (returning
    # the full correlation map) are not implemented; eval path with attn=None only.
    print("KERNEL_OK")
</pallas_src>

<mosaic_0001>
module attributes {stable_mosaic.version = 11 : i64} {
  func.func @_autocorr_layer_kernel(%arg0: i32, %arg1: memref<2x8x32xf32, #tpu.memory_space<vmem>>, %arg2: memref<2x8x32xf32, #tpu.memory_space<vmem>>, %arg3: memref<2x8x32xf32, #tpu.memory_space<vmem>>, %arg4: memref<32x32xf32, #tpu.memory_space<vmem>>, %arg5: memref<1x32xf32, #tpu.memory_space<vmem>>, %arg6: memref<32x32xf32, #tpu.memory_space<vmem>>, %arg7: memref<1x32xf32, #tpu.memory_space<vmem>>, %arg8: memref<32x32xf32, #tpu.memory_space<vmem>>, %arg9: memref<1x32xf32, #tpu.memory_space<vmem>>, %arg10: memref<32x32xf32, #tpu.memory_space<vmem>>, %arg11: memref<1x32xf32, #tpu.memory_space<vmem>>, %arg12: memref<2x8x32xf32, #tpu.memory_space<vmem>>) attributes {dimension_semantics = [#tpu.dimension_semantics<parallel>], iteration_bounds = array<i64: 1>, scalar_prefetch = 0 : i64, scratch_operands = 0 : i64, tpu.core_type = #tpu.core_type<tc>, window_params = [{transform_indices = @transform_0, window_bounds = array<i64: 2, 8, 32>}, {transform_indices = @transform_1, window_bounds = array<i64: 2, 8, 32>}, {transform_indices = @transform_2, window_bounds = array<i64: 2, 8, 32>}, {pipeline_mode = #tpu.pipeline_mode<synchronous>, transform_indices = @transform_3, window_bounds = array<i64: 32, 32>}, {pipeline_mode = #tpu.pipeline_mode<synchronous>, transform_indices = @transform_4, window_bounds = array<i64: 1, 32>}, {pipeline_mode = #tpu.pipeline_mode<synchronous>, transform_indices = @transform_5, window_bounds = array<i64: 32, 32>}, {pipeline_mode = #tpu.pipeline_mode<synchronous>, transform_indices = @transform_6, window_bounds = array<i64: 1, 32>}, {pipeline_mode = #tpu.pipeline_mode<synchronous>, transform_indices = @transform_7, window_bounds = array<i64: 32, 32>}, {pipeline_mode = #tpu.pipeline_mode<synchronous>, transform_indices = @transform_8, window_bounds = array<i64: 1, 32>}, {pipeline_mode = #tpu.pipeline_mode<synchronous>, transform_indices = @transform_9, window_bounds = array<i64: 32, 32>}, {pipeline_mode = #tpu.pipeline_mode<synchronous>, transform_indices = @transform_10, window_bounds = array<i64: 1, 32>}, {transform_indices = @transform_11, window_bounds = array<i64: 2, 8, 32>}]} {
    %c0 = arith.constant 0 : index
    %c0_0 = arith.constant 0 : index
    %c0_1 = arith.constant 0 : index
    %0 = vector.load %arg1[%c0, %c0_0, %c0_1] : memref<2x8x32xf32, #tpu.memory_space<vmem>>, vector<1x8x32xf32>
    %1 = vector.shape_cast %0 : vector<1x8x32xf32> to vector<8x32xf32>
    %c1 = arith.constant 1 : index
    %c0_2 = arith.constant 0 : index
    %c0_3 = arith.constant 0 : index
    %2 = vector.load %arg1[%c1, %c0_2, %c0_3] : memref<2x8x32xf32, #tpu.memory_space<vmem>>, vector<1x8x32xf32>
    %3 = vector.shape_cast %2 : vector<1x8x32xf32> to vector<8x32xf32>
    %4 = tpu.concatenate %1, %3 in 0 : vector<8x32xf32>, vector<8x32xf32> -> vector<16x32xf32>
    %c0_4 = arith.constant 0 : index
    %c0_5 = arith.constant 0 : index
    %c0_6 = arith.constant 0 : index
    %5 = vector.load %arg2[%c0_4, %c0_5, %c0_6] : memref<2x8x32xf32, #tpu.memory_space<vmem>>, vector<1x8x32xf32>
    %6 = vector.shape_cast %5 : vector<1x8x32xf32> to vector<8x32xf32>
    %c1_7 = arith.constant 1 : index
    %c0_8 = arith.constant 0 : index
    %c0_9 = arith.constant 0 : index
    %7 = vector.load %arg2[%c1_7, %c0_8, %c0_9] : memref<2x8x32xf32, #tpu.memory_space<vmem>>, vector<1x8x32xf32>
    %8 = vector.shape_cast %7 : vector<1x8x32xf32> to vector<8x32xf32>
    %9 = tpu.concatenate %6, %8 in 0 : vector<8x32xf32>, vector<8x32xf32> -> vector<16x32xf32>
    %c0_10 = arith.constant 0 : index
    %c0_11 = arith.constant 0 : index
    %c0_12 = arith.constant 0 : index
    %10 = vector.load %arg3[%c0_10, %c0_11, %c0_12] : memref<2x8x32xf32, #tpu.memory_space<vmem>>, vector<1x8x32xf32>
    %11 = vector.shape_cast %10 : vector<1x8x32xf32> to vector<8x32xf32>
    %c1_13 = arith.constant 1 : index
    %c0_14 = arith.constant 0 : index
    %c0_15 = arith.constant 0 : index
    %12 = vector.load %arg3[%c1_13, %c0_14, %c0_15] : memref<2x8x32xf32, #tpu.memory_space<vmem>>, vector<1x8x32xf32>
    %13 = vector.shape_cast %12 : vector<1x8x32xf32> to vector<8x32xf32>
    %14 = tpu.concatenate %11, %13 in 0 : vector<8x32xf32>, vector<8x32xf32> -> vector<16x32xf32>
    %c0_16 = arith.constant 0 : index
    %c0_17 = arith.constant 0 : index
    %15 = vector.load %arg4[%c0_16, %c0_17] : memref<32x32xf32, #tpu.memory_space<vmem>>, vector<32x32xf32>
    %cst = arith.constant dense<0.000000e+00> : vector<16x32xf32>
    %16 = tpu.matmul %4, %15, %cst {dimension_numbers = #tpu.dot_dimension_numbers<[1], [0], [0], [1], [0, 0, 1, 1], [], []>, precision = #tpu.contract_precision<fp32>} : vector<16x32xf32>, vector<32x32xf32>, vector<16x32xf32> -> vector<16x32xf32>
    %c0_18 = arith.constant 0 : index
    %c0_19 = arith.constant 0 : index
    %17 = vector.load %arg5[%c0_18, %c0_19] : memref<1x32xf32, #tpu.memory_space<vmem>>, vector<1x32xf32>
    %18 = vector.broadcast %17 : vector<1x32xf32> to vector<16x32xf32>
    %19 = arith.addf %16, %18 : vector<16x32xf32>
    %c0_20 = arith.constant 0 : index
    %c0_21 = arith.constant 0 : index
    %20 = vector.load %arg6[%c0_20, %c0_21] : memref<32x32xf32, #tpu.memory_space<vmem>>, vector<32x32xf32>
    %cst_22 = arith.constant dense<0.000000e+00> : vector<16x32xf32>
    %21 = tpu.matmul %9, %20, %cst_22 {dimension_numbers = #tpu.dot_dimension_numbers<[1], [0], [0], [1], [0, 0, 1, 1], [], []>, precision = #tpu.contract_precision<fp32>} : vector<16x32xf32>, vector<32x32xf32>, vector<16x32xf32> -> vector<16x32xf32>
    %c0_23 = arith.constant 0 : index
    %c0_24 = arith.constant 0 : index
    %22 = vector.load %arg7[%c0_23, %c0_24] : memref<1x32xf32, #tpu.memory_space<vmem>>, vector<1x32xf32>
    %23 = vector.broadcast %22 : vector<1x32xf32> to vector<16x32xf32>
    %24 = arith.addf %21, %23 : vector<16x32xf32>
    %c0_25 = arith.constant 0 : index
    %c0_26 = arith.constant 0 : index
    %25 = vector.load %arg8[%c0_25, %c0_26] : memref<32x32xf32, #tpu.memory_space<vmem>>, vector<32x32xf32>
    %cst_27 = arith.constant dense<0.000000e+00> : vector<16x32xf32>
    %26 = tpu.matmul %14, %25, %cst_27 {dimension_numbers = #tpu.dot_dimension_numbers<[1], [0], [0], [1], [0, 0, 1, 1], [], []>} : vector<16x32xf32>, vector<32x32xf32>, vector<16x32xf32> -> vector<16x32xf32>
    %c0_28 = arith.constant 0 : index
    %c0_29 = arith.constant 0 : index
    %27 = vector.load %arg9[%c0_28, %c0_29] : memref<1x32xf32, #tpu.memory_space<vmem>>, vector<1x32xf32>
    %28 = vector.broadcast %27 : vector<1x32xf32> to vector<16x32xf32>
    %29 = arith.addf %26, %28 : vector<16x32xf32>
    %30 = tpu.iota {dimensions = array<i32: 0>} : vector<8x8xi32>
    %31 = tpu.iota {dimensions = array<i32: 1>} : vector<8x8xi32>
    %32 = arith.cmpi eq, %30, %31 : vector<8x8xi32>
    %33 = vector.extract_strided_slice %19 {offsets = [0, 0], sizes = [8, 32], strides = [1, 1]} : vector<16x32xf32> to vector<8x32xf32>
    %34 = vector.extract_strided_slice %24 {offsets = [0, 0], sizes = [8, 32], strides = [1, 1]} : vector<16x32xf32> to vector<8x32xf32>
    %35 = vector.extract_strided_slice %29 {offsets = [0, 0], sizes = [8, 32], strides = [1, 1]} : vector<16x32xf32> to vector<8x32xf32>
    %cst_30 = arith.constant dense<0.000000e+00> : vector<8x8xf32>
    %36 = tpu.matmul %34, %33, %cst_30 {dimension_numbers = #tpu.dot_dimension_numbers<[1], [1], [0], [0], [0, 0, 1, 0], [], []>, precision = #tpu.contract_precision<fp32>} : vector<8x32xf32>, vector<8x32xf32>, vector<8x8xf32> -> vector<8x8xf32>
    %37 = tpu.iota {dimensions = array<i32: 0>} : vector<8x8xi32>
    %38 = vector.extract_strided_slice %36 {offsets = [0, 1], sizes = [8, 7], strides = [1, 1]} : vector<8x8xf32> to vector<8x7xf32>
    %39 = vector.extract_strided_slice %36 {offsets = [0, 0], sizes = [8, 1], strides = [1, 1]} : vector<8x8xf32> to vector<8x1xf32>
    %40 = tpu.concatenate %38, %39 in 1 : vector<8x7xf32>, vector<8x1xf32> -> vector<8x8xf32>
    %c1_i32 = arith.constant 1 : i32
    %41 = vector.broadcast %c1_i32 : i32 to vector<8x8xi32>
    %42 = arith.andi %37, %41 : vector<8x8xi32>
    %c0_i32 = arith.constant 0 : i32
    %43 = vector.broadcast %c0_i32 : i32 to vector<8x8xi32>
    %44 = arith.cmpi ne, %42, %43 : vector<8x8xi32>
    %45 = arith.select %44, %40, %36 : vector<8x8xi1>, vector<8x8xf32>
    %46 = vector.extract_strided_slice %45 {offsets = [0, 2], sizes = [8, 6], strides = [1, 1]} : vector<8x8xf32> to vector<8x6xf32>
    %47 = vector.extract_strided_slice %45 {offsets = [0, 0], sizes = [8, 2], strides = [1, 1]} : vector<8x8xf32> to vector<8x2xf32>
    %48 = tpu.concatenate %46, %47 in 1 : vector<8x6xf32>, vector<8x2xf32> -> vector<8x8xf32>
    %c2_i32 = arith.constant 2 : i32
    %49 = vector.broadcast %c2_i32 : i32 to vector<8x8xi32>
    %50 = arith.andi %37, %49 : vector<8x8xi32>
    %c0_i32_31 = arith.constant 0 : i32
    %51 = vector.broadcast %c0_i32_31 : i32 to vector<8x8xi32>
    %52 = arith.cmpi ne, %50, %51 : vector<8x8xi32>
    %53 = arith.select %52, %48, %45 : vector<8x8xi1>, vector<8x8xf32>
    %54 = vector.extract_strided_slice %53 {offsets = [0, 4], sizes = [8, 4], strides = [1, 1]} : vector<8x8xf32> to vector<8x4xf32>
    %55 = vector.extract_strided_slice %53 {offsets = [0, 0], sizes = [8, 4], strides = [1, 1]} : vector<8x8xf32> to vector<8x4xf32>
    %56 = tpu.concatenate %54, %55 in 1 : vector<8x4xf32>, vector<8x4xf32> -> vector<8x8xf32>
    %c4_i32 = arith.constant 4 : i32
    %57 = vector.broadcast %c4_i32 : i32 to vector<8x8xi32>
    %58 = arith.andi %37, %57 : vector<8x8xi32>
    %c0_i32_32 = arith.constant 0 : i32
    %59 = vector.broadcast %c0_i32_32 : i32 to vector<8x8xi32>
    %60 = arith.cmpi ne, %58, %59 : vector<8x8xi32>
    %61 = arith.select %60, %56, %53 : vector<8x8xi1>, vector<8x8xf32>
    %cst_33 = arith.constant dense<0.000000e+00> : vector<8xf32>
    %62 = vector.multi_reduction <add>, %61, %cst_33 [0] : vector<8x8xf32> to vector<8xf32>
    %63 = vector.shape_cast %62 : vector<8xf32> to vector<1x8xf32>
    %cst_34 = arith.constant 3.125000e-02 : f32
    %64 = vector.broadcast %cst_34 : f32 to vector<1x8xf32>
    %65 = arith.mulf %63, %64 : vector<1x8xf32>
    %66 = vector.shape_cast %65 : vector<1x8xf32> to vector<1x8xf32>
    %67 = vector.broadcast %66 : vector<1x8xf32> to vector<8x8xf32>
    %cst_35 = arith.constant 0.000000e+00 : f32
    %68 = vector.broadcast %cst_35 : f32 to vector<8x8xf32>
    %69 = arith.select %32, %67, %68 : vector<8x8xi1>, vector<8x8xf32>
    %cst_36 = arith.constant dense<0.000000e+00> : vector<8xf32>
    %70 = vector.multi_reduction <add>, %69, %cst_36 [1] : vector<8x8xf32> to vector<8xf32>
    %71 = vector.shape_cast %70 : vector<8xf32> to vector<8x1xf32>
    %72 = vector.broadcast %71 : vector<8x1xf32> to vector<8x8xf32>
    %73 = vector.broadcast %65 : vector<1x8xf32> to vector<8x8xf32>
    %74 = arith.cmpf ogt, %72, %73 : vector<8x8xf32>
    %75 = arith.extui %74 : vector<8x8xi1> to vector<8x8xi32>
    %76 = vector.broadcast %71 : vector<8x1xf32> to vector<8x8xf32>
    %77 = vector.broadcast %65 : vector<1x8xf32> to vector<8x8xf32>
    %78 = arith.cmpf oeq, %76, %77 : vector<8x8xf32>
    %79 = arith.cmpi slt, %30, %31 : vector<8x8xi32>
    %80 = arith.andi %78, %79 : vector<8x8xi1>
    %81 = arith.extui %80 : vector<8x8xi1> to vector<8x8xi32>
    %82 = arith.addi %75, %81 : vector<8x8xi32>
    %cst_37 = arith.constant dense<0> : vector<8xi32>
    %83 = vector.multi_reduction <add>, %82, %cst_37 [0] : vector<8x8xi32> to vector<8xi32>
    %84 = vector.shape_cast %83 : vector<8xi32> to vector<1x8xi32>
    %c2_i32_38 = arith.constant 2 : i32
    %85 = vector.broadcast %c2_i32_38 : i32 to vector<1x8xi32>
    %86 = arith.cmpi slt, %84, %85 : vector<1x8xi32>
    %cst_39 = arith.constant dense<0xFF800000> : vector<1xf32>
    %87 = vector.multi_reduction <maximumf>, %65, %cst_39 [1] : vector<1x8xf32> to vector<1xf32>
    %88 = vector.shape_cast %87 : vector<1xf32> to vector<1x1xf32>
    %89 = vector.broadcast %88 : vector<1x1xf32> to vector<1x8xf32>
    %90 = arith.subf %65, %89 : vector<1x8xf32>
    %91 = math.exp %90 : vector<1x8xf32>
    %cst_40 = arith.constant 0.000000e+00 : f32
    %92 = vector.broadcast %cst_40 : f32 to vector<1x8xf32>
    %93 = arith.select %86, %91, %92 : vector<1x8xi1>, vector<1x8xf32>
    %cst_41 = arith.constant dense<0.000000e+00> : vector<1xf32>
    %94 = vector.multi_reduction <add>, %93, %cst_41 [1] : vector<1x8xf32> to vector<1xf32>
    %95 = vector.shape_cast %94 : vector<1xf32> to vector<1x1xf32>
    %96 = vector.broadcast %95 : vector<1x1xf32> to vector<1x8xf32>
    %97 = arith.divf %93, %96 : vector<1x8xf32>
    %98 = vector.shape_cast %97 : vector<1x8xf32> to vector<1x8xf32>
    %99 = vector.broadcast %98 : vector<1x8xf32> to vector<8x8xf32>
    %100 = tpu.iota {dimensions = array<i32: 0>} : vector<8x8xi32>
    %101 = vector.extract_strided_slice %99 {offsets = [0, 7], sizes = [8, 1], strides = [1, 1]} : vector<8x8xf32> to vector<8x1xf32>
    %102 = vector.extract_strided_slice %99 {offsets = [0, 0], sizes = [8, 7], strides = [1, 1]} : vector<8x8xf32> to vector<8x7xf32>
    %103 = tpu.concatenate %101, %102 in 1 : vector<8x1xf32>, vector<8x7xf32> -> vector<8x8xf32>
    %c1_i32_42 = arith.constant 1 : i32
    %104 = vector.broadcast %c1_i32_42 : i32 to vector<8x8xi32>
    %105 = arith.andi %100, %104 : vector<8x8xi32>
    %c0_i32_43 = arith.constant 0 : i32
    %106 = vector.broadcast %c0_i32_43 : i32 to vector<8x8xi32>
    %107 = arith.cmpi ne, %105, %106 : vector<8x8xi32>
    %108 = arith.select %107, %103, %99 : vector<8x8xi1>, vector<8x8xf32>
    %109 = vector.extract_strided_slice %108 {offsets = [0, 6], sizes = [8, 2], strides = [1, 1]} : vector<8x8xf32> to vector<8x2xf32>
    %110 = vector.extract_strided_slice %108 {offsets = [0, 0], sizes = [8, 6], strides = [1, 1]} : vector<8x8xf32> to vector<8x6xf32>
    %111 = tpu.concatenate %109, %110 in 1 : vector<8x2xf32>, vector<8x6xf32> -> vector<8x8xf32>
    %c2_i32_44 = arith.constant 2 : i32
    %112 = vector.broadcast %c2_i32_44 : i32 to vector<8x8xi32>
    %113 = arith.andi %100, %112 : vector<8x8xi32>
    %c0_i32_45 = arith.constant 0 : i32
    %114 = vector.broadcast %c0_i32_45 : i32 to vector<8x8xi32>
    %115 = arith.cmpi ne, %113, %114 : vector<8x8xi32>
    %116 = arith.select %115, %111, %108 : vector<8x8xi1>, vector<8x8xf32>
    %117 = vector.extract_strided_slice %116 {offsets = [0, 4], sizes = [8, 4], strides = [1, 1]} : vector<8x8xf32> to vector<8x4xf32>
    %118 = vector.extract_strided_slice %116 {offsets = [0, 0], sizes = [8, 4], strides = [1, 1]} : vector<8x8xf32> to vector<8x4xf32>
    %119 = tpu.concatenate %117, %118 in 1 : vector<8x4xf32>, vector<8x4xf32> -> vector<8x8xf32>
    %c4_i32_46 = arith.constant 4 : i32
    %120 = vector.broadcast %c4_i32_46 : i32 to vector<8x8xi32>
    %121 = arith.andi %100, %120 : vector<8x8xi32>
    %c0_i32_47 = arith.constant 0 : i32
    %122 = vector.broadcast %c0_i32_47 : i32 to vector<8x8xi32>
    %123 = arith.cmpi ne, %121, %122 : vector<8x8xi32>
    %124 = arith.select %123, %119, %116 : vector<8x8xi1>, vector<8x8xf32>
    %cst_48 = arith.constant dense<0.000000e+00> : vector<8x32xf32>
    %125 = tpu.matmul %124, %35, %cst_48 {dimension_numbers = #tpu.dot_dimension_numbers<[1], [0], [0], [1], [0, 0, 1, 1], [], []>} : vector<8x8xf32>, vector<8x32xf32>, vector<8x32xf32> -> vector<8x32xf32>
    %126 = vector.extract_strided_slice %19 {offsets = [8, 0], sizes = [8, 32], strides = [1, 1]} : vector<16x32xf32> to vector<8x32xf32>
    %127 = vector.extract_strided_slice %24 {offsets = [8, 0], sizes = [8, 32], strides = [1, 1]} : vector<16x32xf32> to vector<8x32xf32>
    %128 = vector.extract_strided_slice %29 {offsets = [8, 0], sizes = [8, 32], strides = [1, 1]} : vector<16x32xf32> to vector<8x32xf32>
    %cst_49 = arith.constant dense<0.000000e+00> : vector<8x8xf32>
    %129 = tpu.matmul %127, %126, %cst_49 {dimension_numbers = #tpu.dot_dimension_numbers<[1], [1], [0], [0], [0, 0, 1, 0], [], []>, precision = #tpu.contract_precision<fp32>} : vector<8x32xf32>, vector<8x32xf32>, vector<8x8xf32> -> vector<8x8xf32>
    %130 = tpu.iota {dimensions = array<i32: 0>} : vector<8x8xi32>
    %131 = vector.extract_strided_slice %129 {offsets = [0, 1], sizes = [8, 7], strides = [1, 1]} : vector<8x8xf32> to vector<8x7xf32>
    %132 = vector.extract_strided_slice %129 {offsets = [0, 0], sizes = [8, 1], strides = [1, 1]} : vector<8x8xf32> to vector<8x1xf32>
    %133 = tpu.concatenate %131, %132 in 1 : vector<8x7xf32>, vector<8x1xf32> -> vector<8x8xf32>
    %c1_i32_50 = arith.constant 1 : i32
    %134 = vector.broadcast %c1_i32_50 : i32 to vector<8x8xi32>
    %135 = arith.andi %130, %134 : vector<8x8xi32>
    %c0_i32_51 = arith.constant 0 : i32
    %136 = vector.broadcast %c0_i32_51 : i32 to vector<8x8xi32>
    %137 = arith.cmpi ne, %135, %136 : vector<8x8xi32>
    %138 = arith.select %137, %133, %129 : vector<8x8xi1>, vector<8x8xf32>
    %139 = vector.extract_strided_slice %138 {offsets = [0, 2], sizes = [8, 6], strides = [1, 1]} : vector<8x8xf32> to vector<8x6xf32>
    %140 = vector.extract_strided_slice %138 {offsets = [0, 0], sizes = [8, 2], strides = [1, 1]} : vector<8x8xf32> to vector<8x2xf32>
    %141 = tpu.concatenate %139, %140 in 1 : vector<8x6xf32>, vector<8x2xf32> -> vector<8x8xf32>
    %c2_i32_52 = arith.constant 2 : i32
    %142 = vector.broadcast %c2_i32_52 : i32 to vector<8x8xi32>
    %143 = arith.andi %130, %142 : vector<8x8xi32>
    %c0_i32_53 = arith.constant 0 : i32
    %144 = vector.broadcast %c0_i32_53 : i32 to vector<8x8xi32>
    %145 = arith.cmpi ne, %143, %144 : vector<8x8xi32>
    %146 = arith.select %145, %141, %138 : vector<8x8xi1>, vector<8x8xf32>
    %147 = vector.extract_strided_slice %146 {offsets = [0, 4], sizes = [8, 4], strides = [1, 1]} : vector<8x8xf32> to vector<8x4xf32>
    %148 = vector.extract_strided_slice %146 {offsets = [0, 0], sizes = [8, 4], strides = [1, 1]} : vector<8x8xf32> to vector<8x4xf32>
    %149 = tpu.concatenate %147, %148 in 1 : vector<8x4xf32>, vector<8x4xf32> -> vector<8x8xf32>
    %c4_i32_54 = arith.constant 4 : i32
    %150 = vector.broadcast %c4_i32_54 : i32 to vector<8x8xi32>
    %151 = arith.andi %130, %150 : vector<8x8xi32>
    %c0_i32_55 = arith.constant 0 : i32
    %152 = vector.broadcast %c0_i32_55 : i32 to vector<8x8xi32>
    %153 = arith.cmpi ne, %151, %152 : vector<8x8xi32>
    %154 = arith.select %153, %149, %146 : vector<8x8xi1>, vector<8x8xf32>
    %cst_56 = arith.constant dense<0.000000e+00> : vector<8xf32>
    %155 = vector.multi_reduction <add>, %154, %cst_56 [0] : vector<8x8xf32> to vector<8xf32>
    %156 = vector.shape_cast %155 : vector<8xf32> to vector<1x8xf32>
    %cst_57 = arith.constant 3.125000e-02 : f32
    %157 = vector.broadcast %cst_57 : f32 to vector<1x8xf32>
    %158 = arith.mulf %156, %157 : vector<1x8xf32>
    %159 = vector.shape_cast %158 : vector<1x8xf32> to vector<1x8xf32>
    %160 = vector.broadcast %159 : vector<1x8xf32> to vector<8x8xf32>
    %cst_58 = arith.constant 0.000000e+00 : f32
    %161 = vector.broadcast %cst_58 : f32 to vector<8x8xf32>
    %162 = arith.select %32, %160, %161 : vector<8x8xi1>, vector<8x8xf32>
    %cst_59 = arith.constant dense<0.000000e+00> : vector<8xf32>
    %163 = vector.multi_reduction <add>, %162, %cst_59 [1] : vector<8x8xf32> to vector<8xf32>
    %164 = vector.shape_cast %163 : vector<8xf32> to vector<8x1xf32>
    %165 = vector.broadcast %164 : vector<8x1xf32> to vector<8x8xf32>
    %166 = vector.broadcast %158 : vector<1x8xf32> to vector<8x8xf32>
    %167 = arith.cmpf ogt, %165, %166 : vector<8x8xf32>
    %168 = arith.extui %167 : vector<8x8xi1> to vector<8x8xi32>
    %169 = vector.broadcast %164 : vector<8x1xf32> to vector<8x8xf32>
    %170 = vector.broadcast %158 : vector<1x8xf32> to vector<8x8xf32>
    %171 = arith.cmpf oeq, %169, %170 : vector<8x8xf32>
    %172 = arith.cmpi slt, %30, %31 : vector<8x8xi32>
    %173 = arith.andi %171, %172 : vector<8x8xi1>
    %174 = arith.extui %173 : vector<8x8xi1> to vector<8x8xi32>
    %175 = arith.addi %168, %174 : vector<8x8xi32>
    %cst_60 = arith.constant dense<0> : vector<8xi32>
    %176 = vector.multi_reduction <add>, %175, %cst_60 [0] : vector<8x8xi32> to vector<8xi32>
    %177 = vector.shape_cast %176 : vector<8xi32> to vector<1x8xi32>
    %c2_i32_61 = arith.constant 2 : i32
    %178 = vector.broadcast %c2_i32_61 : i32 to vector<1x8xi32>
    %179 = arith.cmpi slt, %177, %178 : vector<1x8xi32>
    %cst_62 = arith.constant dense<0xFF800000> : vector<1xf32>
    %180 = vector.multi_reduction <maximumf>, %158, %cst_62 [1] : vector<1x8xf32> to vector<1xf32>
    %181 = vector.shape_cast %180 : vector<1xf32> to vector<1x1xf32>
    %182 = vector.broadcast %181 : vector<1x1xf32> to vector<1x8xf32>
    %183 = arith.subf %158, %182 : vector<1x8xf32>
    %184 = math.exp %183 : vector<1x8xf32>
    %cst_63 = arith.constant 0.000000e+00 : f32
    %185 = vector.broadcast %cst_63 : f32 to vector<1x8xf32>
    %186 = arith.select %179, %184, %185 : vector<1x8xi1>, vector<1x8xf32>
    %cst_64 = arith.constant dense<0.000000e+00> : vector<1xf32>
    %187 = vector.multi_reduction <add>, %186, %cst_64 [1] : vector<1x8xf32> to vector<1xf32>
    %188 = vector.shape_cast %187 : vector<1xf32> to vector<1x1xf32>
    %189 = vector.broadcast %188 : vector<1x1xf32> to vector<1x8xf32>
    %190 = arith.divf %186, %189 : vector<1x8xf32>
    %191 = vector.shape_cast %190 : vector<1x8xf32> to vector<1x8xf32>
    %192 = vector.broadcast %191 : vector<1x8xf32> to vector<8x8xf32>
    %193 = tpu.iota {dimensions = array<i32: 0>} : vector<8x8xi32>
    %194 = vector.extract_strided_slice %192 {offsets = [0, 7], sizes = [8, 1], strides = [1, 1]} : vector<8x8xf32> to vector<8x1xf32>
    %195 = vector.extract_strided_slice %192 {offsets = [0, 0], sizes = [8, 7], strides = [1, 1]} : vector<8x8xf32> to vector<8x7xf32>
    %196 = tpu.concatenate %194, %195 in 1 : vector<8x1xf32>, vector<8x7xf32> -> vector<8x8xf32>
    %c1_i32_65 = arith.constant 1 : i32
    %197 = vector.broadcast %c1_i32_65 : i32 to vector<8x8xi32>
    %198 = arith.andi %193, %197 : vector<8x8xi32>
    %c0_i32_66 = arith.constant 0 : i32
    %199 = vector.broadcast %c0_i32_66 : i32 to vector<8x8xi32>
    %200 = arith.cmpi ne, %198, %199 : vector<8x8xi32>
    %201 = arith.select %200, %196, %192 : vector<8x8xi1>, vector<8x8xf32>
    %202 = vector.extract_strided_slice %201 {offsets = [0, 6], sizes = [8, 2], strides = [1, 1]} : vector<8x8xf32> to vector<8x2xf32>
    %203 = vector.extract_strided_slice %201 {offsets = [0, 0], sizes = [8, 6], strides = [1, 1]} : vector<8x8xf32> to vector<8x6xf32>
    %204 = tpu.concatenate %202, %203 in 1 : vector<8x2xf32>, vector<8x6xf32> -> vector<8x8xf32>
    %c2_i32_67 = arith.constant 2 : i32
    %205 = vector.broadcast %c2_i32_67 : i32 to vector<8x8xi32>
    %206 = arith.andi %193, %205 : vector<8x8xi32>
    %c0_i32_68 = arith.constant 0 : i32
    %207 = vector.broadcast %c0_i32_68 : i32 to vector<8x8xi32>
    %208 = arith.cmpi ne, %206, %207 : vector<8x8xi32>
    %209 = arith.select %208, %204, %201 : vector<8x8xi1>, vector<8x8xf32>
    %210 = vector.extract_strided_slice %209 {offsets = [0, 4], sizes = [8, 4], strides = [1, 1]} : vector<8x8xf32> to vector<8x4xf32>
    %211 = vector.extract_strided_slice %209 {offsets = [0, 0], sizes = [8, 4], strides = [1, 1]} : vector<8x8xf32> to vector<8x4xf32>
    %212 = tpu.concatenate %210, %211 in 1 : vector<8x4xf32>, vector<8x4xf32> -> vector<8x8xf32>
    %c4_i32_69 = arith.constant 4 : i32
    %213 = vector.broadcast %c4_i32_69 : i32 to vector<8x8xi32>
    %214 = arith.andi %193, %213 : vector<8x8xi32>
    %c0_i32_70 = arith.constant 0 : i32
    %215 = vector.broadcast %c0_i32_70 : i32 to vector<8x8xi32>
    %216 = arith.cmpi ne, %214, %215 : vector<8x8xi32>
    %217 = arith.select %216, %212, %209 : vector<8x8xi1>, vector<8x8xf32>
    %cst_71 = arith.constant dense<0.000000e+00> : vector<8x32xf32>
    %218 = tpu.matmul %217, %128, %cst_71 {dimension_numbers = #tpu.dot_dimension_numbers<[1], [0], [0], [1], [0, 0, 1, 1], [], []>} : vector<8x8xf32>, vector<8x32xf32>, vector<8x32xf32> -> vector<8x32xf32>
    %219 = tpu.concatenate %125, %218 in 0 : vector<8x32xf32>, vector<8x32xf32> -> vector<16x32xf32>
    %c0_72 = arith.constant 0 : index
    %c0_73 = arith.constant 0 : index
    %220 = vector.load %arg10[%c0_72, %c0_73] : memref<32x32xf32, #tpu.memory_space<vmem>>, vector<32x32xf32>
    %cst_74 = arith.constant dense<0.000000e+00> : vector<16x32xf32>
    %221 = tpu.matmul %219, %220, %cst_74 {dimension_numbers = #tpu.dot_dimension_numbers<[1], [0], [0], [1], [0, 0, 1, 1], [], []>} : vector<16x32xf32>, vector<32x32xf32>, vector<16x32xf32> -> vector<16x32xf32>
    %c0_75 = arith.constant 0 : index
    %c0_76 = arith.constant 0 : index
    %222 = vector.load %arg11[%c0_75, %c0_76] : memref<1x32xf32, #tpu.memory_space<vmem>>, vector<1x32xf32>
    %223 = vector.broadcast %222 : vector<1x32xf32> to vector<16x32xf32>
    %224 = arith.addf %221, %223 : vector<16x32xf32>
    %225 = vector.extract_strided_slice %224 {offsets = [0, 0], sizes = [8, 32], strides = [1, 1]} : vector<16x32xf32> to vector<8x32xf32>
    %c0_77 = arith.constant 0 : index
    %c0_78 = arith.constant 0 : index
    %c0_79 = arith.constant 0 : index
    %226 = vector.load %arg12[%c0_77, %c0_78, %c0_79] : memref<2x8x32xf32, #tpu.memory_space<vmem>>, vector<1x8x32xf32>
    %227 = vector.shape_cast %226 : vector<1x8x32xf32> to vector<8x32xf32>
    %228 = vector.shape_cast %225 : vector<8x32xf32> to vector<1x8x32xf32>
    tpu.vector_store %arg12[%c0_77, %c0_78, %c0_79], %228 {strides = array<i32>} : memref<2x8x32xf32, #tpu.memory_space<vmem>>, vector<1x8x32xf32>,
    %229 = vector.extract_strided_slice %224 {offsets = [8, 0], sizes = [8, 32], strides = [1, 1]} : vector<16x32xf32> to vector<8x32xf32>
    %c1_80 = arith.constant 1 : index
    %c0_81 = arith.constant 0 : index
    %c0_82 = arith.constant 0 : index
    %230 = vector.load %arg12[%c1_80, %c0_81, %c0_82] : memref<2x8x32xf32, #tpu.memory_space<vmem>>, vector<1x8x32xf32>
    %231 = vector.shape_cast %230 : vector<1x8x32xf32> to vector<8x32xf32>
    %232 = vector.shape_cast %229 : vector<8x32xf32> to vector<1x8x32xf32>
    tpu.vector_store %arg12[%c1_80, %c0_81, %c0_82], %232 {strides = array<i32>} : memref<2x8x32xf32, #tpu.memory_space<vmem>>, vector<1x8x32xf32>,
    return
  }
  func.func @transform_0(%arg0: i32) -> (i32, i32, i32) {
    %c0_i32 = arith.constant 0 : i32
    %c0_i32_0 = arith.constant 0 : i32
    %c0_i32_1 = arith.constant 0 : i32
    return %arg0, %c0_i32, %c0_i32_0 : i32, i32, i32
  }
  func.func @transform_1(%arg0: i32) -> (i32, i32, i32) {
    %c0_i32 = arith.constant 0 : i32
    %c0_i32_0 = arith.constant 0 : i32
    %c0_i32_1 = arith.constant 0 : i32
    return %arg0, %c0_i32, %c0_i32_0 : i32, i32, i32
  }
  func.func @transform_2(%arg0: i32) -> (i32, i32, i32) {
    %c0_i32 = arith.constant 0 : i32
    %c0_i32_0 = arith.constant 0 : i32
    %c0_i32_1 = arith.constant 0 : i32
    return %arg0, %c0_i32, %c0_i32_0 : i32, i32, i32
  }
  func.func @transform_3(%arg0: i32) -> (i32, i32) {
    %c0_i32 = arith.constant 0 : i32
    %c0_i32_0 = arith.constant 0 : i32
    %c0_i32_1 = arith.constant 0 : i32
    return %c0_i32, %c0_i32_0 : i32, i32
  }
  func.func @transform_4(%arg0: i32) -> (i32, i32) {
    %c0_i32 = arith.constant 0 : i32
    %c0_i32_0 = arith.constant 0 : i32
    %c0_i32_1 = arith.constant 0 : i32
    return %c0_i32, %c0_i32_0 : i32, i32
  }
  func.func @transform_5(%arg0: i32) -> (i32, i32) {
    %c0_i32 = arith.constant 0 : i32
    %c0_i32_0 = arith.constant 0 : i32
    %c0_i32_1 = arith.constant 0 : i32
    return %c0_i32, %c0_i32_0 : i32, i32
  }
  func.func @transform_6(%arg0: i32) -> (i32, i32) {
    %c0_i32 = arith.constant 0 : i32
    %c0_i32_0 = arith.constant 0 : i32
    %c0_i32_1 = arith.constant 0 : i32
    return %c0_i32, %c0_i32_0 : i32, i32
  }
  func.func @transform_7(%arg0: i32) -> (i32, i32) {
    %c0_i32 = arith.constant 0 : i32
    %c0_i32_0 = arith.constant 0 : i32
    %c0_i32_1 = arith.constant 0 : i32
    return %c0_i32, %c0_i32_0 : i32, i32
  }
  func.func @transform_8(%arg0: i32) -> (i32, i32) {
    %c0_i32 = arith.constant 0 : i32
    %c0_i32_0 = arith.constant 0 : i32
    %c0_i32_1 = arith.constant 0 : i32
    return %c0_i32, %c0_i32_0 : i32, i32
  }
  func.func @transform_9(%arg0: i32) -> (i32, i32) {
    %c0_i32 = arith.constant 0 : i32
    %c0_i32_0 = arith.constant 0 : i32
    %c0_i32_1 = arith.constant 0 : i32
    return %c0_i32, %c0_i32_0 : i32, i32
  }
  func.func @transform_10(%arg0: i32) -> (i32, i32) {
    %c0_i32 = arith.constant 0 : i32
    %c0_i32_0 = arith.constant 0 : i32
    %c0_i32_1 = arith.constant 0 : i32
    return %c0_i32, %c0_i32_0 : i32, i32
  }
  func.func @transform_11(%arg0: i32) -> (i32, i32, i32) {
    %c0_i32 = arith.constant 0 : i32
    %c0_i32_0 = arith.constant 0 : i32
    %c0_i32_1 = arith.constant 0 : i32
    return %arg0, %c0_i32, %c0_i32_0 : i32, i32, i32
  }
}

</mosaic_0001>

<bundles_post_ra>
// kernel: tpu_custom_call.1
= control target key start
LH: loop header
LB: loop body
LE: loop exit
PB: predicated region body
PF: predicated region fallthrough
CT: control target
= control target key end

     0   :  { %16 = vsyncpa [#allocation3], 0  ;;  %s3755_s0 = inlined_call_operand.hbm [shape: f32[2,8,32], index: 0, kind: input, shape index: {}]   ;;  %s3756_s1 = inlined_call_operand.hbm [shape: f32[2,8,32], index: 1, kind: input, shape index: {}]   ;;  %s3757_s2 = inlined_call_operand.hbm [shape: f32[2,8,32], index: 2, kind: input, shape index: {}]   ;;  %s3758_s3 = inlined_call_operand.hbm [shape: f32[32,32], index: 3, kind: input, shape index: {}]   ;;  %s3759_s4 = inlined_call_operand.vmem [shape: f32[1,32], index: 4, kind: input, shape index: {}]   ;;  %s3760_s5 = inlined_call_operand.hbm [shape: f32[32,32], index: 5, kind: input, shape index: {}]   ;;  %s3761_s6 = inlined_call_operand.vmem [shape: f32[1,32], index: 6, kind: input, shape index: {}]   ;;  %s3762_s7 = inlined_call_operand.hbm [shape: f32[32,32], index: 7, kind: input, shape index: {}]   ;;  %s3763_s8 = inlined_call_operand.vmem [shape: f32[1,32], index: 8, kind: input, shape index: {}]   ;;  %s3764_s9 = inlined_call_operand.hbm [shape: f32[32,32], index: 9, kind: input, shape index: {}]   ;;  %s3765_s10 = inlined_call_operand.vmem [shape: f32[1,32], index: 10, kind: input, shape index: {}]   ;;  %s3766_s11 = inlined_call_operand.hbm [shape: f32[2,8,32], index: 11, kind: output, shape index: {}]  }
   0x1   :  { %17 = vsyncpa [#allocation6], 0 }
   0x2   :  { %18 = vsyncpa [#allocation9], 0 }
   0x3   :  { %19 = vsyncpa [#allocation12], 0 }
   0x4   :  { %20 = vsyncpa [#allocation4], 0  ;;  %s3240_s17 = smov [#allocation5]   ;;  %s3241_s19 = smov [#allocation8]  }
   0x5   :  { %s38_s18 = sshll.u32 %s3240_s17, 4  ;;  %s62_s20 = sshll.u32 %s3241_s19, 4  ;;  %s39_s18 = int_to_ptr.vmem [resolvable:$true] %s38_s18  ;;  %s63_s20 = int_to_ptr.vmem [resolvable:$true] %s62_s20 }
   0x6   :  { %s3078_s21 = scalar_lea.vmem %s39_s18, 256  ;;  %p3083_p1 = scmp.lt.s32.totalorder %s39_s18, %s39_s18 }
   0x7   :  { %p3079_p0 = scmp.ne.s32.totalorder %s39_s18, %s3078_s21  ;;  %p3084_p2 = scmp.lt.s32.totalorder %s3078_s21, %s3078_s21 }
   0x9   :  { %p3085_p3 = por %p3084_p2, %p3083_p1 }
   0xb   :  { %p3086_p4 = pnand %p3085_p3, %p3079_p0 }
   0xd   :  { %3089 = shalt.err (!%p3086_p4)
}
   0xe   :  { %s3242_s22 = smov 128   ;;  %s3243_s23 = smov 8  }
   0xf   :  { %44 = dma.hbm_to_vmem [thread:$0]  %s3756_s1, 256, %s39_s18, [#allocation6], %s3242_s22, %s3242_s22, %s3243_s23  }
  0x10   :  { %s3098_s26 = scalar_lea.vmem %s63_s20, 512  ;;  %p3103_p6 = scmp.lt.s32.totalorder %s63_s20, %s63_s20 }
  0x11   :  { %p3099_p5 = scmp.ne.s32.totalorder %s63_s20, %s3098_s26  ;;  %p3104_p7 = scmp.lt.s32.totalorder %s3098_s26, %s3098_s26 }
  0x13   :  { %p3105_p8 = por %p3104_p7, %p3103_p6 }
  0x15   :  { %p3106_p9 = pnand %p3105_p8, %p3099_p5 }
  0x17   :  { %3109 = shalt.err (!%p3106_p9)
}
  0x18   :  { %68 = dma.hbm_to_vmem [thread:$0]  %s3758_s3, 512, %s63_s20, [#allocation9], %s3242_s22, %s3242_s22, %s3243_s23  }
  0x19   :  { %s3244_s29 = smov [#allocation11]   ;;  %s3245_s12 = smov [#allocation2]  }
  0x1a   :  { %s90_s30 = sshll.u32 %s3244_s29, 4  ;;  %s26_s13 = sshll.u32 %s3245_s12, 4  ;;  %s91_s30 = int_to_ptr.vmem [resolvable:$true] %s90_s30  ;;  %s27_s13 = int_to_ptr.vmem [resolvable:$true] %s26_s13 }
  0x1b   :  { %s3118_s1 = scalar_lea.vmem %s91_s30, 512  ;;  %p3123_p11 = scmp.lt.s32.totalorder %s91_s30, %s91_s30 }
  0x1c   :  { %p3119_p10 = scmp.ne.s32.totalorder %s91_s30, %s3118_s1  ;;  %p3124_p12 = scmp.lt.s32.totalorder %s3118_s1, %s3118_s1 }
  0x1e   :  { %p3125_p13 = por %p3124_p12, %p3123_p11 }
  0x20   :  { %p3126_p0 = pnand %p3125_p13, %p3119_p10 }
  0x22   :  { %3129 = shalt.err (!%p3126_p0)
}
  0x23   :  { %96 = dma.hbm_to_vmem [thread:$0]  %s3762_s7, 512, %s91_s30, [#allocation12], %s3242_s22, %s3242_s22, %s3243_s23  }
  0x24   :  { %s3138_s3 = scalar_lea.vmem %s27_s13, 256  ;;  %p3143_p2 = scmp.lt.s32.totalorder %s27_s13, %s27_s13 }
  0x25   :  { %p3139_p1 = scmp.ne.s32.totalorder %s27_s13, %s3138_s3  ;;  %p3144_p3 = scmp.lt.s32.totalorder %s3138_s3, %s3138_s3 }
  0x27   :  { %p3145_p4 = por %p3144_p3, %p3143_p2 }
  0x29   :  { %p3146_p5 = pnand %p3145_p4, %p3139_p1 }
  0x2b   :  { %3149 = shalt.err (!%p3146_p5)
}
  0x2c   :  { %32 = dma.hbm_to_vmem [thread:$0]  %s3755_s0, 256, %s27_s13, [#allocation3], %s3242_s22, %s3242_s22, %s3243_s23  }
  0x2d   :  { %s3246_s18 = smov [#allocation7]   ;;  %s3247_s20 = smov [#allocation10]  }
  0x2e   :  { %s50_s19 = sshll.u32 %s3246_s18, 4  ;;  %s76_s21 = sshll.u32 %s3247_s20, 4  ;;  %s51_s19 = int_to_ptr.vmem [resolvable:$true] %s50_s19  ;;  %s77_s21 = int_to_ptr.vmem [resolvable:$true] %s76_s21 }
  0x2f   :  { %s3158_s7 = scalar_lea.vmem %s51_s19, 256  ;;  %p3163_p7 = scmp.lt.s32.totalorder %s51_s19, %s51_s19 }
  0x30   :  { %p3159_p6 = scmp.ne.s32.totalorder %s51_s19, %s3158_s7  ;;  %p3164_p8 = scmp.lt.s32.totalorder %s3158_s7, %s3158_s7 }
  0x32   :  { %p3165_p9 = por %p3164_p8, %p3163_p7 }
  0x34   :  { %p3166_p10 = pnand %p3165_p9, %p3159_p6 }
  0x36   :  { %3169 = shalt.err (!%p3166_p10)
}
  0x37   :  { %56 = dma.hbm_to_vmem [thread:$0]  %s3757_s2, 256, %s51_s19, [#allocation6], %s3242_s22, %s3242_s22, %s3243_s23  }
  0x38   :  { %s3178_s0 = scalar_lea.vmem %s77_s21, 512  ;;  %p3183_p12 = scmp.lt.s32.totalorder %s77_s21, %s77_s21 }
  0x39   :  { %p3179_p11 = scmp.ne.s32.totalorder %s77_s21, %s3178_s0  ;;  %p3184_p13 = scmp.lt.s32.totalorder %s3178_s0, %s3178_s0 }
  0x3b   :  { %p3185_p0 = por %p3184_p13, %p3183_p12 }
  0x3d   :  { %p3186_p1 = pnand %p3185_p0, %p3179_p11 }
  0x3f   :  { %3189 = shalt.err (!%p3186_p1)
}
  0x40   :  { %82 = dma.hbm_to_vmem [thread:$0]  %s3760_s5, 512, %s77_s21, [#allocation9], %s3242_s22, %s3242_s22, %s3243_s23  }
  0x41   :  { %s3248_s28 = smov [#allocation13]  }
  0x42   :  { %s104_s29 = sshll.u32 %s3248_s28, 4  ;;  %s105_s29 = int_to_ptr.vmem [resolvable:$true] %s104_s29 }
  0x43   :  { %s3198_s30 = scalar_lea.vmem %s105_s29, 512  ;;  %p3203_p3 = scmp.lt.s32.totalorder %s105_s29, %s105_s29 }
  0x44   :  { %p3199_p2 = scmp.ne.s32.totalorder %s105_s29, %s3198_s30  ;;  %p3204_p4 = scmp.lt.s32.totalorder %s3198_s30, %s3198_s30 }
  0x46   :  { %p3205_p5 = por %p3204_p4, %p3203_p3 }
  0x48   :  { %p3206_p6 = pnand %p3205_p5, %p3199_p2 }
  0x4a   :  { %3209 = shalt.err (!%p3206_p6)
}
  0x4b   :  { %110 = dma.hbm_to_vmem [thread:$0]  %s3764_s9, 512, %s105_s29, [#allocation12], %s3242_s22, %s3242_s22, %s3243_s23  }
  0x4c   :  { %3230 = dma.done.wait [#allocation3], 256  }
  0x4d   :  { %3231 = vsyncadd [#allocation3], 4294967040 }
  0x4e   :  { %3232 = dma.done.wait [#allocation6], 512  }
  0x4f   :  { %3233 = vsyncadd [#allocation6], 4294966784 }
  0x50   :  { %3234 = dma.done.wait [#allocation9], 1024  }
  0x51   :  { %3235 = vsyncadd [#allocation9], 4294966272 }
  0x52   :  { %3236 = dma.done.wait [#allocation12], 1024  }
  0x53   :  { %3237 = vsyncadd [#allocation12], 4294966272  ;;  %vm154_vm0 = vcmask 261120   ;;  %v146_v0 = vld [vmem:[#allocation8 + $0x18] sm:$0xff]  ;;  %v145_v1 = vld [vmem:[#allocation8 + $0x10] sm:$0xff]  ;;  %vm3250_vm1 = vmmov 0  }
  0x54   :  { %v144_v2 = vld [vmem:[#allocation8 + $0x8] sm:$0xff]  ;;  %v3365_v3 = vand.u32 4294901760, %v146_v0  ;;  %v3367_v4 = vand.u32 4294901760, %v145_v1  ;;  %v143_v6 = vld [vmem:[#allocation8] sm:$0xff]  ;;  %v134_v7 = vld [vmem:[#allocation2] sm:$0xff]  ;;  %s3252_s14 = smov 7  }
  0x55   :  { %v3369_v5 = vand.u32 4294901760, %v144_v2  ;;  %v136_v8 = vld [vmem:[#allocation2 + $0x8] sm:$0xff]  ;;  %v3371_v9 = vand.u32 4294901760, %v143_v6  ;;  %v156_v10 = vsel %vm154_vm0, %v134_v7, 0  ;;  %v137_v38 = vld [vmem:[#allocation5] sm:$0xff]  ;;  %v139_v40 = vld [vmem:[#allocation5 + $0x8] sm:$0xff] }
  0x56   :  { %v159_v11 = vsel %vm154_vm0, %v136_v8, 0  ;;  %2815 = vmatprep.subr.mxu0 %v3365_v3  ;;  %v276_v12 = vsub.f32 %v146_v0, %v3365_v3  ;;  %v3377_v13 = vand.u32 4294901760, %v156_v10  ;;  %v283_v14 = vsub.f32 %v145_v1, %v3367_v4  ;;  %v692_v39 = vld [vmem:[#allocation10 + $0x18] sm:$0xff]  ;;  %v691_v41 = vld [vmem:[#allocation10 + $0x10] sm:$0xff]  ;;  %v690_v46 = vld [vmem:[#allocation10 + $0x8] sm:$0xff]  ;;  %s3253_s15 = smov 126  }
  0x57   :  { %v3380_v15 = vand.u32 4294901760, %v159_v11  ;;  %2816 = vmatpush3.msra.mxu0 %v3365_v3  ;;  %v290_v16 = vsub.f32 %v144_v2, %v3369_v5  ;;  %v297_v17 = vsub.f32 %v143_v6, %v3371_v9  ;;  %v701_v42 = vsel %vm154_vm0, %v137_v38, 0  ;;  %v689_v49 = vld [vmem:[#allocation10] sm:$0xff]  ;;  %s3254_s3 = smov 6   ;;  %s3255_s16 = smov 4  }
  0x58   :  { %2817 = vmatprep.subr.mxu0 %v3367_v4  ;;  %v277_v18 = vand.u32 4294901760, %v276_v12  ;;  %v3387_v19 = vsub.f32 %v156_v10, %v3377_v13  ;;  %v3389_v20 = vand.u32 4294901760, %v283_v14  ;;  %2834 = vmatprep.mubr.f32.mxu1 %v3377_v13  ;;  %v3418_v43 = vand.u32 4294901760, %v692_v39  ;;  %s3256_s17 = smov 124   ;;  %s3258_s18 = smov 1  }
  0x59   :  { %v3392_v21 = vsub.f32 %v159_v11, %v3380_v15  ;;  %2818 = vmatpush3.msra.mxu0 %v3367_v4  ;;  %v3396_v22 = vand.u32 4294901760, %v290_v16  ;;  %v3398_v23 = vand.u32 4294901760, %v297_v17  ;;  %v704_v44 = vsel %vm154_vm0, %v139_v40, 0  ;;  %s3259_s19 = smov 121   ;;  %s3260_s20 = smov 2  }
  0x5a   :  { %2819 = vmatprep.subr.mxu0 %v3369_v5  ;;  %v278_v24 = vsub.f32 %v276_v12, %v277_v18  ;;  %v232_v25 = vand.u32 4294901760, %v3387_v19  ;;  %v285_v26 = vsub.f32 %v283_v14, %v3389_v20  ;;  %v3424_v45 = vand.u32 4294901760, %v691_v41  ;;  %s3261_s21 = smov 122   ;;  %s3262_s25 = smov [#allocation14]  }
  0x5b   :  { %v242_v27 = vand.u32 4294901760, %v3392_v21  ;;  %2820 = vmatpush3.msra.mxu0 %v3369_v5  ;;  %v292_v28 = vsub.f32 %v290_v16, %v3396_v22  ;;  %v299_v29 = vsub.f32 %v297_v17, %v3398_v23  ;;  %v3426_v47 = vand.u32 4294901760, %v701_v42  ;;  %s2678_s0 = sshll.u32 %s3262_s25, 4  ;;  %s2679_s0 = int_to_ptr.vmem [resolvable:$true] %s2678_s0 }
  0x5c   :  { %2821 = vmatprep.subr.mxu0 %v3371_v9  ;;  %v279_v30 = vand.u32 4294901760, %v278_v24  ;;  %v233_v31 = vsub.f32 %v3387_v19, %v232_v25  ;;  %v286_v32 = vand.u32 4294901760, %v285_v26  ;;  %v3429_v48 = vand.u32 4294901760, %v704_v44  ;;  %s3210_s26 = scalar_lea.vmem %s2679_s0, 256  ;;  %p3215_p8 = scmp.lt.s32.totalorder %s2679_s0, %s2679_s0 }
  0x5d   :  { %v243_v33 = vsub.f32 %v3392_v21, %v242_v27  ;;  %2822 = vmatpush3.msra.mxu0 %v3371_v9  ;;  %v293_v36 = vand.u32 4294901760, %v292_v28  ;;  %v300_v37 = vand.u32 4294901760, %v299_v29  ;;  %v3433_v50 = vsub.f32 %v692_v39, %v3418_v43  ;;  %p3211_p7 = scmp.ne.s32.totalorder %s2679_s0, %s3210_s26  ;;  %p3216_p9 = scmp.lt.s32.totalorder %s3210_s26, %s3210_s26 }
  0x5e   :  { %2826 = vmatprep.subr.mxu1 %v279_v30  ;;  %v234_v34 = vand.u32 4294901760, %v233_v31  ;;  %2837 = vmatprep.subr.mxu0 %v276_v12  ;;  %v3437_v51 = vand.u32 4294901760, %v690_v46  ;;  %v3442_v52 = vsub.f32 %v701_v42, %v3426_v47  ;;  %v828_v53 = vsub.f32 %v691_v41, %v3424_v45 }
  0x5f   :  { %v244_v35 = vand.u32 4294901760, %v243_v33  ;;  %2827 = vmatpush3.msra.mxu1 %v279_v30  ;;  %v3447_v54 = vand.u32 4294901760, %v689_v49  ;;  %v3450_v55 = vsub.f32 %v704_v44, %v3429_v48  ;;  %v3456_v56 = vand.u32 4294901760, %v3433_v50  ;;  %p3217_p10 = por %p3216_p9, %p3215_p8 }
  0x60   :  { %2823 = vmatprep.mubr.f32.mxu0 %v234_v34  ;;  %2828 = vmatprep.subr.mxu1 %v286_v32  ;;  %v835_v57 = vsub.f32 %v690_v46, %v3437_v51  ;;  %v777_v58 = vand.u32 4294901760, %v3442_v52  ;;  %v3465_v59 = vand.u32 4294901760, %v828_v53  ;;  %vm1790_vm2 = vcmask 56320  }
  0x61   :  { %2824 = vmatmul.mubr.f32.vlgmr.msra.gmra.mxu0 %v244_v35  ;;  %2829 = vmatpush3.msra.mxu1 %v286_v32  ;;  %v787_v60 = vand.u32 4294901760, %v3450_v55  ;;  %v842_v61 = vsub.f32 %v689_v49, %v3447_v54  ;;  %v823_v62 = vsub.f32 %v3433_v50, %v3456_v56  ;;  %vm1802_vm4 = vcmask 48128   ;;  %p3218_p11 = pnand %p3217_p10, %p3211_p7 }
  0x62   :  { %2838 = vmatpush3.msra.mxu0 %v276_v12  ;;  %2830 = vmatprep.subr.mxu1 %v293_v36  ;;  %v836_v63 = vand.u32 4294901760, %v835_v57  ;;  %v778_v0 = vsub.f32 %v3442_v52, %v777_v58  ;;  %v830_v1 = vsub.f32 %v828_v53, %v3465_v59  ;;  %v1237_v12 = vld [vmem:[#allocation11 + $0x18] sm:$0xff]  ;;  %vm1814_vm6 = vcmask 31744  }
  0x63   :  { %2839 = vmatprep.subr.mxu0 %v283_v14  ;;  %2831 = vmatpush3.msra.mxu1 %v293_v36  ;;  %v788_v2 = vsub.f32 %v3450_v55, %v787_v60  ;;  %vm1819_vm8 = vcmask 64512   ;;  %vm1866_vm15 = vcmask 7168  }
  0x64   :  { %2840 = vmatpush3.msra.mxu0 %v283_v14  ;;  %2832 = vmatprep.subr.mxu1 %v300_v37  ;;  %v837_v6 = vsub.f32 %v835_v57, %v836_v63  ;;  %v779_v7 = vand.u32 4294901760, %v778_v0  ;;  %v831_v8 = vand.u32 4294901760, %v830_v1  ;;  %v3249_v14 = vmov 0.0  }
  0x65   :  { %2841 = vmatprep.subr.mxu0 %v290_v16  ;;  %2833 = vmatpush3.msra.mxu1 %v300_v37  ;;  %v789_v10 = vand.u32 4294901760, %v788_v2 }
  0x66   :  { %2842 = vmatpush3.msra.mxu0 %v290_v16  ;;  %2835 = vmatmul.mubr.f32.vlgmr.msra.gmra.mxu1 %v3380_v15  ;;  %v838_v11 = vand.u32 4294901760, %v837_v6  ;;  %v1234_v16 = vld [vmem:[#allocation11] sm:$0xff] }
  0x67   :  { %2843 = vmatprep.subr.mxu0 %v297_v17  ;;  %2848 = vmatprep.subr.mxu1 %v3365_v3 }
  0x68   :  { %2844 = vmatpush3.msra.mxu0 %v297_v17  ;;  %2845 = vmatprep.mubr.f32.mxu0 %v3387_v19  ;;  %v140_v17 = vld [vmem:[#allocation7] sm:$0xff] }
  0x69   :  { %2849 = vmatpush3.msra.mxu1 %v3365_v3  ;;  %2846 = vmatmul.mubr.f32.vlgmr.msra.gmra.mxu0 %v3392_v21 }
  0x6a   :  { %2850 = vmatprep.subr.mxu1 %v3367_v4  ;;  %2859 = vmatprep.subr.mxu0 %v277_v18 }
  0x6b   :  { %2851 = vmatpush3.msra.mxu1 %v3367_v4  ;;  %2860 = vmatpush3.msra.mxu0 %v277_v18  ;;  %v142_v18 = vld [vmem:[#allocation7 + $0x8] sm:$0xff] }
  0x6c   :  { %2852 = vmatprep.subr.mxu1 %v3369_v5  ;;  %2861 = vmatprep.subr.mxu0 %v3389_v20 }
  0x6d   :  { %2853 = vmatpush3.msra.mxu1 %v3369_v5  ;;  %2862 = vmatpush3.msra.mxu0 %v3389_v20  ;;  %v2693_v20 = vld [vmem:[%s3759_s4] ss:$0 sm:$0xff] }
  0x6e   :  { %2854 = vmatprep.subr.mxu1 %v3371_v9  ;;  %2863 = vmatprep.subr.mxu0 %v3396_v22 }
  0x6f   :  { %2855 = vmatpush3.msra.mxu1 %v3371_v9  ;;  %2856 = vmatprep.mubr.f32.mxu1 %v232_v25 }
  0x70   :  { %2864 = vmatpush3.msra.mxu0 %v3396_v22  ;;  %2857 = vmatmul.mubr.f32.vlgmr.msra.gmra.mxu1 %v242_v27 }
  0x71   :  { %2865 = vmatprep.subr.mxu0 %v3398_v23  ;;  %2870 = vmatprep.subr.mxu1 %v3365_v3 }
  0x72   :  { %2866 = vmatpush3.msra.mxu0 %v3398_v23  ;;  %2867 = vmatprep.mubr.f32.mxu0 %v3377_v13 }
  0x73   :  { %2871 = vmatpush3.msra.mxu1 %v3365_v3  ;;  %2868 = vmatmul.mubr.f32.vlgmr.msra.gmra.mxu0 %v3380_v15  ;;  %v843_v3 = vand.u32 4294901760, %v842_v61 }
  0x74   :  { %2872 = vmatprep.subr.mxu1 %v3367_v4  ;;  %2881 = vmatprep.subr.mxu0 %v3418_v43 }
  0x75   :  { %2873 = vmatpush3.msra.mxu1 %v3367_v4  ;;  %2882 = vmatpush3.msra.mxu0 %v3418_v43  ;;  %v824_v4 = vand.u32 4294901760, %v823_v62 }
  0x76   :  { %2874 = vmatprep.subr.mxu1 %v3369_v5  ;;  %2883 = vmatprep.subr.mxu0 %v3424_v45 }
  0x77   :  { %2875 = vmatpush3.msra.mxu1 %v3369_v5  ;;  %2884 = vmatpush3.msra.mxu0 %v3424_v45  ;;  %v844_v5 = vsub.f32 %v842_v61, %v843_v3 }
  0x78   :  { %2876 = vmatprep.subr.mxu1 %v3371_v9  ;;  %2885 = vmatprep.subr.mxu0 %v3437_v51 }
  0x79   :  { %2877 = vmatpush3.msra.mxu1 %v3371_v9  ;;  %2878 = vmatprep.mubr.f32.mxu1 %v3377_v13  ;;  %v845_v9 = vand.u32 4294901760, %v844_v5  ;;  %v1236_v13 = vld [vmem:[#allocation11 + $0x10] sm:$0xff] }
  0x7a   :  { %2886 = vmatpush3.msra.mxu0 %v3437_v51  ;;  %2879 = vmatmul.mubr.f32.vlgmr.msra.gmra.mxu1 %v3380_v15  ;;  %v1235_v15 = vld [vmem:[#allocation11 + $0x8] sm:$0xff] }
  0x7b   :  { %2887 = vmatprep.subr.mxu0 %v3447_v54  ;;  %2892 = vmatprep.subr.mxu1 %v824_v4 }
  0x7c   :  { %2888 = vmatpush3.msra.mxu0 %v3447_v54  ;;  %2893 = vmatpush3.msra.mxu1 %v824_v4 }
  0x7d   :  { %2889 = vmatprep.mubr.f32.mxu0 %v779_v7  ;;  %2894 = vmatprep.subr.mxu1 %v831_v8 }
  0x7e   :  { %2903 = vmatprep.subr.mxu0 %v3433_v50  ;;  %2890 = vmatmul.mubr.f32.vlgmr.msra.gmra.mxu0 %v789_v10 }
  0x7f   :  { %2895 = vmatpush3.msra.mxu1 %v831_v8  ;;  %2904 = vmatpush3.msra.mxu0 %v3433_v50 }
  0x80   :  { %2896 = vmatprep.subr.mxu1 %v838_v11  ;;  %2905 = vmatprep.subr.mxu0 %v828_v53 }
  0x81   :  { %2897 = vmatpush3.msra.mxu1 %v838_v11  ;;  %2906 = vmatpush3.msra.mxu0 %v828_v53 }
  0x82   :  { %2898 = vmatprep.subr.mxu1 %v845_v9  ;;  %2907 = vmatprep.subr.mxu0 %v835_v57 }
  0x83   :  { %2899 = vmatpush3.msra.mxu1 %v845_v9  ;;  %2900 = vmatprep.mubr.f32.mxu1 %v3426_v47 }
  0x84   :  { %2908 = vmatpush3.msra.mxu0 %v835_v57  ;;  %2901 = vmatmul.mubr.f32.vlgmr.msra.gmra.mxu1 %v3429_v48 }
  0x85   :  { %2909 = vmatprep.subr.mxu0 %v842_v61  ;;  %2914 = vmatprep.subr.mxu1 %v3418_v43 }
  0x86   :  { %2910 = vmatpush3.msra.mxu0 %v842_v61  ;;  %2911 = vmatprep.mubr.f32.mxu0 %v3442_v52 }
  0x87   :  { %2915 = vmatpush3.msra.mxu1 %v3418_v43  ;;  %2912 = vmatmul.mubr.f32.vlgmr.msra.gmra.mxu0 %v3450_v55 }
  0x88   :  { %2916 = vmatprep.subr.mxu1 %v3424_v45  ;;  %2925 = vmatprep.subr.mxu0 %v3456_v56 }
  0x89   :  { %2917 = vmatpush3.msra.mxu1 %v3424_v45  ;;  %2926 = vmatpush3.msra.mxu0 %v3456_v56 }
  0x8a   :  { %2918 = vmatprep.subr.mxu1 %v3437_v51  ;;  %2927 = vmatprep.subr.mxu0 %v3465_v59 }
  0x8b   :  { %2919 = vmatpush3.msra.mxu1 %v3437_v51  ;;  %2928 = vmatpush3.msra.mxu0 %v3465_v59 }
  0x8c   :  { %2920 = vmatprep.subr.mxu1 %v3447_v54  ;;  %2929 = vmatprep.subr.mxu0 %v836_v63 }
  0x8d   :  { %2921 = vmatpush3.msra.mxu1 %v3447_v54  ;;  %2922 = vmatprep.mubr.f32.mxu1 %v777_v58 }
  0x8e   :  { %2930 = vmatpush3.msra.mxu0 %v836_v63  ;;  %2923 = vmatmul.mubr.f32.vlgmr.msra.gmra.mxu1 %v787_v60 }
  0x8f   :  { %2931 = vmatprep.subr.mxu0 %v843_v3  ;;  %2936 = vmatprep.subr.mxu1 %v3418_v43 }
  0x90   :  { %2932 = vmatpush3.msra.mxu0 %v843_v3  ;;  %2933 = vmatprep.mubr.f32.mxu0 %v3426_v47 }
  0x91   :  { %2937 = vmatpush3.msra.mxu1 %v3418_v43  ;;  %2934 = vmatmul.mubr.f32.vlgmr.msra.gmra.mxu0 %v3429_v48 }
  0x92   :  { %2938 = vmatprep.subr.mxu1 %v3424_v45  ;;  %2944 = vmatprep.mubr.f32.mxu1 %v3426_v47 }
  0x93   :  { %2939 = vmatpush3.msra.mxu1 %v3424_v45  ;;  %2947 = vmatprep.subr.mxu0 %v1237_v12 }
  0x94   :  { %2940 = vmatprep.subr.mxu1 %v3437_v51  ;;  %2948 = vmatpush3.msra.mxu0 %v1237_v12 }
  0x95   :  { %2941 = vmatpush3.msra.mxu1 %v3437_v51  ;;  %2949 = vmatprep.subr.mxu0 %v1236_v13 }
  0x96   :  { %2942 = vmatprep.subr.mxu1 %v3447_v54  ;;  %2950 = vmatpush3.msra.mxu0 %v1236_v13 }
  0x97   :  { %2943 = vmatpush3.msra.mxu1 %v3447_v54  ;;  %2951 = vmatprep.subr.mxu0 %v1235_v15  ;;  %v2694_v54 = vld [vmem:[%s3761_s6] ss:$0 sm:$0xff] }
  0x98   :  { %2945 = vmatmul.mubr.f32.vlgmr.msra.gmra.mxu1 %v3429_v48  ;;  %2958 = vmatprep.subr.mxu1 %v3249_v14 }
  0x99   :  { %2952 = vmatpush3.msra.mxu0 %v1235_v15  ;;  %2955 = vmatprep.mubr.msk.f32.mxu0 %vm154_vm0, %v140_v17 }
  0x9a   :  { %2953 = vmatprep.subr.mxu0 %v1234_v16  ;;  %2960 = vmatprep.mubr.msk.f32.mxu1 %vm3250_vm1, %v3249_v14 }
  0x9b   :  { %2954 = vmatpush3.msra.mxu0 %v1234_v16 }
  0x9c   :  { %2978 = vmatprep.subr.mxu0 %v3249_v14  ;;  %2956 = vmatmul.mubr.msk.f32.vlgmr.msra.gmra.mxu0 %vm154_vm0, %v142_v18 }
  0x9d   :  { %2980 = vmatprep.mubr.msk.f32.mxu0 %vm3250_vm1, %v3249_v14 }
 0x121   :  { %v2825_v19 = vpop.f32.mrf.mxu0 }
 0x122   :  { %v247_v23 = vadd.f32 %v2825_v19, %v2693_v20 }
 0x123   :  { %v236_v21 = vpop.f32.mrf.mxu0 }
 0x124   :  { %v237_v24 = vadd.f32 %v2693_v20, %v236_v21 }
 0x126   :  { %v2836_v22 = vpop.f32.mrf.mxu1 }
 0x127   :  { %v344_v27 = vadd.f32 %v2836_v22, %v247_v23 }
 0x128   :  { %v337_v25 = vpop.f32.mrf.mxu1 }
 0x129   :  { %v2847_v26 = vpop.f32.mrf.mxu0  ;;  %v338_v29 = vadd.f32 %v337_v25, %v237_v24 }
 0x12a   :  { %v431_v31 = vadd.f32 %v2847_v26, %v344_v27 }
 0x12b   :  { %v423_v30 = vpop.f32.mrf.mxu0 }
 0x12c   :  { %v424_v34 = vadd.f32 %v423_v30, %v338_v29  ;;  %v2695_v29 = vld [vmem:[%s3763_s8] ss:$0 sm:$0xff]  ;;  %s3251_s8 = smov 127  }
 0x130   :  { %v2858_v28 = vpop.f32.mrf.mxu1 }
 0x131   :  { %v516_v35 = vadd.f32 %v2858_v28, %v431_v31 }
 0x132   :  { %v507_v32 = vpop.f32.mrf.mxu1 }
 0x133   :  { %v2869_v33 = vpop.f32.mrf.mxu0  ;;  %v508_v36 = vadd.f32 %v507_v32, %v424_v34 }
 0x134   :  { %v605_v38 = vadd.f32 %v2869_v33, %v516_v35 }
 0x135   :  { %v598_v37 = vpop.f32.mrf.mxu0 }
 0x136   :  { %v599_v40 = vadd.f32 %v598_v37, %v508_v36 }
 0x13a   :  { %v2880_v39 = vpop.f32.mrf.mxu1 }
 0x13b   :  { %v686_v41 = vadd.f32 %v2880_v39, %v605_v38 }
 0x13c   :  { %v679_v42 = vpop.f32.mrf.mxu1 }
 0x13d   :  { %v1965_v43 = vsel %vm154_vm0, %v686_v41, 0  ;;  %v680_v44 = vadd.f32 %v679_v42, %v599_v40 }
 0x13e   :  { %v3544_v45 = vand.u32 4294901760, %v1965_v43  ;;  %v2891_v51 = vpop.f32.mrf.mxu0 }
 0x13f   :  { %v1335_v46 = vsel %vm154_vm0, %v680_v44, 0  ;;  %v792_v1 = vadd.f32 %v2891_v51, %v2694_v54 }
 0x140   :  { %v3548_v47 = vsub.f32 %v1965_v43, %v3544_v45  ;;  %v1368_v48 = vand.u32 4294901760, %v1335_v46  ;;  %v781_v55 = vpop.f32.mrf.mxu0 }
 0x141   :  { %v782_v57 = vadd.f32 %v2694_v54, %v781_v55 }
 0x142   :  { %v1445_v49 = vsub.f32 %v1335_v46, %v1368_v48  ;;  %2959 = vmatpush3.xpose.msra.mxu1 %v1368_v48  ;;  %v2076_v50 = vand.u32 4294901760, %v3548_v47 }
 0x143   :  { %2963 = vmatprep.subr.mxu1 %v3249_v14 }
 0x144   :  { %v1446_v52 = vand.u32 4294901760, %v1445_v49  ;;  %v3555_v53 = vsub.f32 %v3548_v47, %v2076_v50  ;;  %v2902_v56 = vpop.f32.mrf.mxu1 }
 0x145   :  { %v889_v6 = vadd.f32 %v2902_v56, %v792_v1 }
 0x146   :  { %2979 = vmatpush3.xpose.msra.mxu0 %v1446_v52  ;;  %v882_v58 = vpop.f32.mrf.mxu1  ;;  %v1447_v19 = vsub.f32 %v1445_v49, %v1446_v52 }
 0x147   :  { %2988 = vmatprep.subr.mxu0 %v3249_v14  ;;  %v2913_v59 = vpop.f32.mrf.mxu0  ;;  %v883_v61 = vadd.f32 %v882_v58, %v782_v57 }
 0x148   :  { %v976_v5 = vadd.f32 %v2913_v59, %v889_v6  ;;  %v1448_v23 = vand.u32 4294901760, %v1447_v19  ;;  %v1326_v59 = vlaneseq  ;;  %v2700_v6 = vld [vmem:[%s3765_s10] ss:$0 sm:$0xff] }
 0x149   :  { %v968_v62 = vpop.f32.mrf.mxu0 }
 0x14a   :  { %v969_v2 = vadd.f32 %v968_v62, %v883_v61 }
 0x14e   :  { %v2924_v60 = vpop.f32.mrf.mxu1 }
 0x14f   :  { %v1061_v9 = vadd.f32 %v2924_v60, %v976_v5  ;;  %v3615_v60 = vshrl.u32 %v1326_v59, 7 }
 0x150   :  { %v1052_v63 = vpop.f32.mrf.mxu1 }
 0x151   :  { %v2935_v0 = vpop.f32.mrf.mxu0  ;;  %v1053_v3 = vadd.f32 %v1052_v63, %v969_v2  ;;  %v1792_v61 = vand.u32 1, %v3615_v60  ;;  %v1816_v5 = vand.u32 4, %v3615_v60 }
 0x152   :  { %v1150_v16 = vadd.f32 %v2935_v0, %v1061_v9 }
 0x153   :  { %v1143_v4 = vpop.f32.mrf.mxu0  ;;  %vm3618_vm3 = vcmp.ne.s32.totalorder %v1792_v61, 0  ;;  %vm3638_vm7 = vcmp.ne.s32.totalorder %v1816_v5, 0 }
 0x154   :  { %v1144_v8 = vadd.f32 %v1143_v4, %v1053_v3  ;;  %v1804_v3 = vand.u32 2, %v3615_v60 }
 0x156   :  { %vm3628_vm5 = vcmp.ne.s32.totalorder %v1804_v3, 0 }
 0x158   :  { %v2946_v7 = vpop.f32.mrf.mxu1 }
 0x159   :  { %v1231_v18 = vadd.f32 %v2946_v7, %v1150_v16 }
 0x15a   :  { %v1224_v10 = vpop.f32.mrf.mxu1 }
 0x15b   :  { %v1225_v11 = vadd.f32 %v1224_v10, %v1144_v8  ;;  %v1962_v22 = vsel %vm154_vm0, %v1231_v18, 0 }
 0x15c   :  { %v3567_v24 = vand.u32 4294901760, %v1962_v22  ;;  %v2957_v30 = vpop.f32.mrf.mxu0 }
 0x15d   :  { %v1332_v12 = vsel %vm154_vm0, %v1225_v11, 0  ;;  %v1323_v31 = vadd.f32 %v2957_v30, %v2695_v29 }
 0x15e   :  { %v1403_v13 = vand.u32 4294901760, %v1332_v12  ;;  %v3573_v25 = vsub.f32 %v1962_v22, %v3567_v24  ;;  %v1317_v32 = vpop.f32.mrf.mxu0 }
 0x15f   :  { %v1318_v33 = vadd.f32 %v2695_v29, %v1317_v32 }
 0x160   :  { %v1404_v15 = vsub.f32 %v1332_v12, %v1403_v13  ;;  %2981 = vmatmul.mubr.f32.vlgmr.msra.gmra.mxu0 %v1403_v13  ;;  %v2035_v26 = vand.u32 4294901760, %v3573_v25 }
 0x161   :  { %2990 = vmatprep.mubr.msk.f32.mxu0 %vm3250_vm1, %v3249_v14  ;;  %2989 = vmatpush3.msra.mxu0 %v1318_v33 }
 0x162   :  { %v1405_v17 = vand.u32 4294901760, %v1404_v15  ;;  %v2036_v27 = vsub.f32 %v3573_v25, %v2035_v26  ;;  %2998 = vmatprep.subr.mxu0 %v3249_v14 }
 0x164   :  { %v1406_v20 = vsub.f32 %v1404_v15, %v1405_v17  ;;  %v2037_v28 = vand.u32 4294901760, %v2036_v27 }
 0x166   :  { %v1407_v21 = vand.u32 4294901760, %v1406_v20 }
 0x168   :  { %2961 = vmatmul.mubr.f32.vlgmr.msra.gmra.mxu1 %v1407_v21  ;;  %v3646_v21 = vand.u32 127, %v1326_v59 }
 0x169   :  { %2964 = vmatpush3.xpose.msra.mxu1 %v1448_v23  ;;  %2965 = vmatprep.mubr.msk.f32.mxu1 %vm3250_vm1, %v3249_v14 }
 0x16a   :  { %2968 = vmatprep.subr.mxu1 %v3249_v14  ;;  %vm1330_vm9 = vcmp.eq.s32.totalorder %v3615_v60, %v3646_v21  ;;  %vm1835_vm10 = vcmp.lt.s32.totalorder %v3615_v60, %v3646_v21 }
 0x16c   :  { %2966 = vmatmul.mubr.f32.vlgmr.msra.gmra.mxu1 %v1403_v13 }
 0x16d   :  { %2969 = vmatpush3.xpose.msra.mxu1 %v1445_v49  ;;  %2970 = vmatprep.mubr.msk.f32.mxu1 %vm3250_vm1, %v3249_v14 }
 0x16e   :  { %2973 = vmatprep.subr.mxu1 %v3249_v14 }
 0x170   :  { %2971 = vmatmul.mubr.f32.vlgmr.msra.gmra.mxu1 %v1404_v15 }
 0x171   :  { %2974 = vmatpush3.xpose.msra.mxu1 %v1368_v48  ;;  %2975 = vmatprep.mubr.msk.f32.mxu1 %vm3250_vm1, %v3249_v14 }
 0x172   :  { %2983 = vmatprep.subr.mxu1 %v3249_v14 }
 0x174   :  { %2976 = vmatmul.mubr.f32.vlgmr.msra.gmra.mxu1 %v1405_v17 }
 0x175   :  { %2984 = vmatpush3.xpose.msra.mxu1 %v1368_v48  ;;  %2985 = vmatprep.mubr.msk.f32.mxu1 %vm3250_vm1, %v3249_v14 }
 0x176   :  { %2993 = vmatprep.subr.mxu1 %v3249_v14 }
 0x178   :  { %2986 = vmatmul.mubr.f32.vlgmr.msra.gmra.mxu1 %v1403_v13 }
 0x179   :  { %2994 = vmatpush3.xpose.msra.mxu1 %v3544_v45  ;;  %2995 = vmatprep.mubr.msk.f32.mxu1 %vm3250_vm1, %v3249_v14 }
 0x17a   :  { %3003 = vmatprep.subr.mxu1 %v3249_v14 }
 0x17c   :  { %2996 = vmatmul.mubr.f32.vlgmr.msra.gmra.mxu1 %v2037_v28 }
 0x17d   :  { %3004 = vmatpush3.xpose.msra.mxu1 %v3548_v47  ;;  %3005 = vmatprep.mubr.msk.f32.mxu1 %vm3250_vm1, %v3249_v14 }
 0x17e   :  { %3013 = vmatprep.subr.mxu1 %v3249_v14 }
 0x180   :  { %3006 = vmatmul.mubr.f32.vlgmr.msra.gmra.mxu1 %v3573_v25 }
 0x181   :  { %3014 = vmatpush3.xpose.msra.mxu1 %v2076_v50  ;;  %3015 = vmatprep.mubr.msk.f32.mxu1 %vm3250_vm1, %v3249_v14 }
 0x182   :  { %3023 = vmatprep.subr.mxu1 %v3249_v14 }
 0x184   :  { %3016 = vmatmul.mubr.f32.vlgmr.msra.gmra.mxu1 %v3567_v24 }
 0x185   :  { %3025 = vmatprep.mubr.msk.f32.mxu1 %vm3250_vm1, %v3249_v14  ;;  %3024 = vmatpush3.msra.mxu1 %v1323_v31 }
 0x220   :  { %v1707_v34 = vpop.f32.mrf.mxu0 }
 0x222   :  { %v2982_v35 = vpop.f32.mrf.mxu0 }
 0x223   :  { %v3257_v35 = vmov 0  }
 0x228   :  { %v1409_v36 = vpop.f32.mrf.mxu1 }
 0x22a   :  { %v2962_v37 = vpop.f32.mrf.mxu1 }
 0x22c   :  { %v1485_v38 = vpop.f32.mrf.mxu1 }
 0x22d   :  { %v1486_v41 = vadd.f32 %v1485_v38, %v1409_v36 }
 0x22e   :  { %v2967_v39 = vpop.f32.mrf.mxu1 }
 0x230   :  { %v1559_v40 = vpop.f32.mrf.mxu1 }
 0x231   :  { %v1560_v43 = vadd.f32 %v1559_v40, %v1486_v41 }
 0x232   :  { %v2972_v42 = vpop.f32.mrf.mxu1 }
 0x234   :  { %v1633_v44 = vpop.f32.mrf.mxu1 }
 0x235   :  { %v1634_v46 = vadd.f32 %v1633_v44, %v1560_v43 }
 0x236   :  { %v2977_v47 = vpop.f32.mrf.mxu1 }
 0x237   :  { %v1708_v48 = vadd.f32 %v1707_v34, %v1634_v46 }
 0x238   :  { %v1779_v49 = vpop.f32.mrf.mxu1 }
 0x239   :  { %v1780_v50 = vadd.f32 %v1779_v49, %v1708_v48 }
 0x23a   :  { %v2987_v51 = vpop.f32.mrf.mxu1 }
 0x23b   :  { %1784 = vrot.lane.b32.xlu0 %v1780_v50, %s3251_s8 }
 0x23c   :  { %v3608_v52 = vpop.f32.mrf.mxu1 }
 0x23e   :  { %v2997_v54 = vpop.f32.mrf.mxu1 }
 0x23f   :  { %1787 = vrot.lane.b32.xlu0 %v1780_v50, %s3252_s14 }
 0x240   :  { %v3611_v55 = vpop.f32.mrf.mxu1 }
 0x242   :  { %v3007_v56 = vpop.f32.mrf.mxu1 }
 0x244   :  { %v3613_v57 = vpop.f32.mrf.mxu1 }
 0x246   :  { %v3017_v58 = vpop.f32.mrf.mxu1 }
 0x2ad   :  { %v1785_v62 = vpop.permute.xlu0 %1784 }
 0x2b1   :  { %v1788_v0 = vpop.permute.xlu0 %1787 }
 0x2b2   :  { %v1791_v1 = vsel %vm1790_vm2, %v1785_v62, %v1788_v0 }
 0x2b3   :  { %v1794_v2 = vsel %vm3618_vm3, %v1791_v1, %v1780_v50 }
 0x2b4   :  { %1796 = vrot.lane.b32.xlu1 %v1794_v2, %s3253_s15 }
 0x2b8   :  { %1799 = vrot.lane.b32.xlu1 %v1794_v2, %s3254_s3 }
 0x326   :  { %v1797_v4 = vpop.permute.xlu1 %1796 }
 0x32a   :  { %v1800_v7 = vpop.permute.xlu1 %1799 }
 0x32b   :  { %v1803_v8 = vsel %vm1802_vm4, %v1797_v4, %v1800_v7 }
 0x32c   :  { %v1806_v10 = vsel %vm3628_vm5, %v1803_v8, %v1794_v2 }
 0x32d   :  { %1811 = vrot.lane.b32.xlu1 %v1806_v10, %s3255_s16  ;;  %1808 = vrot.lane.b32.xlu0 %v1806_v10, %s3256_s17 }
 0x39f   :  { %v1812_v9 = vpop.permute.xlu1 %1811  ;;  %v1809_v12 = vpop.permute.xlu0 %1808 }
 0x3a0   :  { %v1815_v13 = vsel %vm1814_vm6, %v1809_v12, %v1812_v9 }
 0x3a1   :  { %v1818_v15 = vsel %vm3638_vm7, %v1815_v13, %v1806_v10  ;;  %v2078_v10 = vand.u32 4294901760, %v3555_v53 }
 0x3a2   :  { %v1820_v16 = vsel %vm1819_vm8, %v1818_v15, 0.0 }
 0x3a3   :  { %v1821_v17 = vrot.slane %v1820_v16, 4 }
 0x3a5   :  { %v1822_v18 = vadd.f32 %v1821_v17, %v1820_v16 }
 0x3a7   :  { %v1823_v19 = vrot.slane %v1822_v18, 2 }
 0x3a9   :  { %v1824_v20 = vadd.f32 %v1823_v19, %v1822_v18 }
 0x3ab   :  { %v1825_v22 = vrot.slane %v1824_v20, 1 }
 0x3ad   :  { %v1826_v23 = vadd.f32 %v1825_v22, %v1824_v20 }
 0x3af   :  { %v1827_v27 = vmul.f32 0.03125, %v1826_v23 }
 0x3b1   :  { %v1847_v28 = vsel %vm1819_vm8, %v1827_v27, -inf  ;;  %v1828_v29 = vsel %vm1330_vm9, %v1827_v27, 0.0 }
 0x3b2   :  { %1848 = vmax.xlane.f32.xlu1 %v1847_v28  ;;  %v1829_v30 = vsel %vm1819_vm8, %v1828_v29, 0.0 }
 0x3b3   :  { %1830 = vadd.xlane.f32.xlu0 %v1829_v30 }
 0x43b   :  { %v1849_v31 = vpop.xlane.xlu1 %1848 }
 0x43c   :  { %v1850_v32 = vsub.f32 %v1827_v27, %v1849_v31  ;;  %v1831_v33 = vpop.xlane.xlu0 %1830 }
 0x43d   :  { %vm1832_vm11 = vcmp.gt.f32.partialorder %v1831_v33, %v1827_v27  ;;  %vm1834_vm12 = vcmp.eq.f32.partialorder %v1831_v33, %v1827_v27 }
 0x43e   :  { %v1851_v34 = vmul.f32 1.442695, %v1850_v32  ;;  %v1833_v36 = vsel %vm1832_vm11, 1, %v3257_v35  ;;  %vm1836_vm13 = vmand %vm1834_vm12, %vm1835_vm10  ;;  %vm1876_vm11 = vcmask 15360  }
 0x43f   :  { %v1837_v37 = vsel %vm1836_vm13, 1, %v3257_v35 }
 0x440   :  { %v1838_v38 = vadd.s32 %v1837_v37, %v1833_v36  ;;  %3062 = vpow2.f32 %v1851_v34 }
 0x442   :  { %v1839_v39 = vsel %vm1819_vm8, %v1838_v38, 0 }
 0x443   :  { %v1840_v40 = vrot.slane %v1839_v39, 4 }
 0x445   :  { %v1841_v41 = vadd.s32 %v1840_v40, %v1839_v39 }
 0x447   :  { %v1842_v42 = vrot.slane %v1841_v41, 2 }
 0x449   :  { %v1843_v43 = vadd.s32 %v1842_v42, %v1841_v41 }
 0x44b   :  { %v1844_v44 = vrot.slane %v1843_v43, 1 }
 0x44d   :  { %v1845_v46 = vadd.s32 %v1844_v44, %v1843_v43  ;;  %v3063_v47 = vpop.eup %3062 }
 0x44f   :  { %vm1846_vm14 = vcmp.lt.s32.totalorder %v1845_v46, 2 }
 0x450   :  { %v1853_v48 = vsel %vm1846_vm14, %v3063_v47, 0.0 }
 0x451   :  { %v1854_v49 = vsel %vm1819_vm8, %v1853_v48, 0.0 }
 0x452   :  { %1855 = vadd.xlane.f32.xlu0 %v1854_v49 }
 0x4db   :  { %v1856_v50 = vpop.xlane.xlu0 %1855 }
 0x4dc   :  { %3064 = vrcp.f32 %v1856_v50 }
 0x4e9   :  { %v3065_v51 = vpop.eup %3064 }
 0x4ea   :  { %v1858_v54 = vmul.f32 %v3065_v51, %v1853_v48 }
 0x4ec   :  { %1863 = vrot.lane.b32.xlu1 %v1858_v54, %s3258_s18  ;;  %1860 = vrot.lane.b32.xlu0 %v1858_v54, %s3259_s19 }
 0x55e   :  { %v1864_v56 = vpop.permute.xlu1 %1863  ;;  %v1861_v58 = vpop.permute.xlu0 %1860 }
 0x55f   :  { %v1867_v59 = vsel %vm1866_vm15, %v1861_v58, %v1864_v56 }
 0x560   :  { %v1868_v61 = vsel %vm3618_vm3, %v1867_v59, %v1858_v54 }
 0x561   :  { %1873 = vrot.lane.b32.xlu0 %v1868_v61, %s3260_s20  ;;  %1870 = vrot.lane.b32.xlu1 %v1868_v61, %s3261_s21 }
 0x5d3   :  { %v1874_v62 = vpop.permute.xlu0 %1873  ;;  %v1871_v0 = vpop.permute.xlu1 %1870 }
 0x5d4   :  { %v1877_v1 = vsel %vm1876_vm11, %v1871_v0, %v1874_v62 }
 0x5d5   :  { %v1878_v2 = vsel %vm3628_vm5, %v1877_v1, %v1868_v61 }
 0x5d6   :  { %1883 = vrot.lane.b32.xlu0 %v1878_v2, %s3255_s16  ;;  %1880 = vrot.lane.b32.xlu1 %v1878_v2, %s3256_s17 }
 0x648   :  { %v1884_v3 = vpop.permute.xlu0 %1883  ;;  %v1881_v4 = vpop.permute.xlu1 %1880 }
 0x649   :  { %v1886_v7 = vsel %vm1814_vm6, %v1881_v4, %v1884_v3 }
 0x64a   :  { %v1887_v8 = vsel %vm3638_vm7, %v1886_v7, %v1878_v2 }
 0x64b   :  { %2991 = vmatmul.mubr.msk.f32.vlgmr.msra.gmra.mxu0 %vm1819_vm8, %v1887_v8 }
 0x64c   :  { %2999 = vmatpush3.xpose.msra.mxu0 %v2078_v10  ;;  %3000 = vmatprep.mubr.msk.f32.mxu0 %vm3250_vm1, %v3249_v14  ;;  %v2581_v10 = vld [vmem:[#allocation13 + $0x18] sm:$0xff] }
 0x64d   :  { %3008 = vmatprep.subr.mxu0 %v3249_v14 }
 0x64f   :  { %3001 = vmatmul.mubr.f32.vlgmr.msra.gmra.mxu0 %v3567_v24 }
 0x650   :  { %3009 = vmatpush3.xpose.msra.mxu0 %v3544_v45  ;;  %3010 = vmatprep.mubr.msk.f32.mxu0 %vm3250_vm1, %v3249_v14 }
 0x651   :  { %3018 = vmatprep.subr.mxu0 %v3249_v14 }
 0x653   :  { %3011 = vmatmul.mubr.f32.vlgmr.msra.gmra.mxu0 %v2035_v26 }
 0x654   :  { %3019 = vmatpush3.xpose.msra.mxu0 %v3544_v45  ;;  %3020 = vmatprep.mubr.msk.f32.mxu0 %vm3250_vm1, %v3249_v14 }
 0x655   :  { %3028 = vmatprep.subr.mxu0 %v2581_v10 }
 0x657   :  { %3021 = vmatmul.mubr.f32.vlgmr.msra.gmra.mxu0 %v3567_v24 }
 0x658   :  { %3029 = vmatpush3.msra.mxu0 %v2581_v10 }
 0x70b   :  { %v1957_v53 = vpop.f32.mrf.mxu0 }
 0x70c   :  { %3036 = vmatprep.mubr.msk.f32.mxu0 %vm154_vm0, %v1957_v53  ;;  %v2580_v53 = vld [vmem:[#allocation13 + $0x10] sm:$0xff] }
 0x70d   :  { %v2992_v5 = vpop.f32.mrf.mxu0  ;;  %3030 = vmatprep.subr.mxu0 %v2580_v53 }
 0x70e   :  { %v2579_v5 = vld [vmem:[#allocation13 + $0x8] sm:$0xff]  ;;  %3031 = vmatpush3.msra.mxu0 %v2580_v53 }
 0x70f   :  { %v2115_v9 = vpop.f32.mrf.mxu0  ;;  %3032 = vmatprep.subr.mxu0 %v2579_v5 }
 0x710   :  { %v2116_v12 = vadd.f32 %v2115_v9, %v3608_v52  ;;  %3033 = vmatpush3.msra.mxu0 %v2579_v5 }
 0x711   :  { %v3002_v13 = vpop.f32.mrf.mxu0 }
 0x712   :  { %v2190_v15 = vadd.f32 %v3611_v55, %v2116_v12  ;;  %v2578_v12 = vld [vmem:[#allocation13] sm:$0xff] }
 0x713   :  { %v2263_v16 = vpop.f32.mrf.mxu0  ;;  %3034 = vmatprep.subr.mxu0 %v2578_v12 }
 0x714   :  { %v2264_v25 = vadd.f32 %v2263_v16, %v2190_v15  ;;  %3035 = vmatpush3.msra.mxu0 %v2578_v12 }
 0x715   :  { %v3012_v26 = vpop.f32.mrf.mxu0 }
 0x716   :  { %v2338_v45 = vadd.f32 %v3613_v57, %v2264_v25 }
 0x717   :  { %v2409_v17 = vpop.f32.mrf.mxu0 }
 0x718   :  { %v2410_v18 = vadd.f32 %v2409_v17, %v2338_v45 }
 0x719   :  { %v3022_v14 = vpop.f32.mrf.mxu0 }
 0x71a   :  { %2417 = vrot.lane.b32.xlu0 %v2410_v18, %s3252_s14  ;;  %2414 = vrot.lane.b32.xlu1 %v2410_v18, %s3251_s8 }
 0x78c   :  { %v2418_v24 = vpop.permute.xlu0 %2417  ;;  %v2415_v19 = vpop.permute.xlu1 %2414 }
 0x78d   :  { %v2420_v20 = vsel %vm1790_vm2, %v2415_v19, %v2418_v24 }
 0x78e   :  { %v2421_v52 = vsel %vm3618_vm3, %v2420_v20, %v2410_v18 }
 0x78f   :  { %2426 = vrot.lane.b32.xlu0 %v2421_v52, %s3254_s3  ;;  %2423 = vrot.lane.b32.xlu1 %v2421_v52, %s3253_s15 }
 0x801   :  { %v2427_v55 = vpop.permute.xlu0 %2426  ;;  %v2424_v57 = vpop.permute.xlu1 %2423 }
 0x802   :  { %v2429_v22 = vsel %vm1802_vm4, %v2424_v57, %v2427_v55 }
 0x803   :  { %v2430_v23 = vsel %vm3628_vm5, %v2429_v22, %v2421_v52 }
 0x804   :  { %2435 = vrot.lane.b32.xlu0 %v2430_v23, %s3255_s16  ;;  %2432 = vrot.lane.b32.xlu1 %v2430_v23, %s3256_s17 }
 0x876   :  { %v2436_v27 = vpop.permute.xlu0 %2435  ;;  %v2433_v28 = vpop.permute.xlu1 %2432 }
 0x877   :  { %v2438_v29 = vsel %vm1814_vm6, %v2433_v28, %v2436_v27 }
 0x878   :  { %v2439_v30 = vsel %vm3638_vm7, %v2438_v29, %v2430_v23 }
 0x879   :  { %v2440_v31 = vsel %vm1819_vm8, %v2439_v30, 0.0 }
 0x87a   :  { %v2441_v32 = vrot.slane %v2440_v31, 4 }
 0x87c   :  { %v2442_v33 = vadd.f32 %v2441_v32, %v2440_v31 }
 0x87e   :  { %v2443_v34 = vrot.slane %v2442_v33, 2 }
 0x880   :  { %v2444_v36 = vadd.f32 %v2443_v34, %v2442_v33 }
 0x882   :  { %v2445_v37 = vrot.slane %v2444_v36, 1 }
 0x884   :  { %v2446_v38 = vadd.f32 %v2445_v37, %v2444_v36 }
 0x886   :  { %v2447_v39 = vmul.f32 0.03125, %v2446_v38 }
 0x888   :  { %v2466_v40 = vsel %vm1819_vm8, %v2447_v39, -inf  ;;  %v2448_v41 = vsel %vm1330_vm9, %v2447_v39, 0.0 }
 0x889   :  { %2467 = vmax.xlane.f32.xlu0 %v2466_v40  ;;  %v2449_v42 = vsel %vm1819_vm8, %v2448_v41, 0.0 }
 0x88a   :  { %2450 = vadd.xlane.f32.xlu1 %v2449_v42 }
 0x912   :  { %v2468_v43 = vpop.xlane.xlu0 %2467 }
 0x913   :  { %v2469_v44 = vsub.f32 %v2447_v39, %v2468_v43  ;;  %v2451_v46 = vpop.xlane.xlu1 %2450 }
 0x914   :  { %vm2452_vm1 = vcmp.gt.f32.partialorder %v2451_v46, %v2447_v39  ;;  %vm2454_vm2 = vcmp.eq.f32.partialorder %v2451_v46, %v2447_v39 }
 0x915   :  { %v2470_v47 = vmul.f32 1.442695, %v2469_v44  ;;  %v2453_v48 = vsel %vm2452_vm1, 1, %v3257_v35  ;;  %vm2455_vm4 = vmand %vm2454_vm2, %vm1835_vm10 }
 0x916   :  { %v2456_v49 = vsel %vm2455_vm4, 1, %v3257_v35 }
 0x917   :  { %v2457_v50 = vadd.s32 %v2456_v49, %v2453_v48  ;;  %3066 = vpow2.f32 %v2470_v47 }
 0x919   :  { %v2458_v51 = vsel %vm1819_vm8, %v2457_v50, 0 }
 0x91a   :  { %v2459_v54 = vrot.slane %v2458_v51, 4 }
 0x91c   :  { %v2460_v56 = vadd.s32 %v2459_v54, %v2458_v51 }
 0x91e   :  { %v2461_v58 = vrot.slane %v2460_v56, 2 }
 0x920   :  { %v2462_v59 = vadd.s32 %v2461_v58, %v2460_v56 }
 0x922   :  { %v2463_v61 = vrot.slane %v2462_v59, 1 }
 0x924   :  { %v2464_v62 = vadd.s32 %v2463_v61, %v2462_v59  ;;  %v3067_v0 = vpop.eup %3066 }
 0x926   :  { %vm2465_vm9 = vcmp.lt.s32.totalorder %v2464_v62, 2 }
 0x927   :  { %v2472_v1 = vsel %vm2465_vm9, %v3067_v0, 0.0 }
 0x928   :  { %v2473_v2 = vsel %vm1819_vm8, %v2472_v1, 0.0 }
 0x929   :  { %2474 = vadd.xlane.f32.xlu0 %v2473_v2 }
 0x9b2   :  { %v2475_v60 = vpop.xlane.xlu0 %2474 }
 0x9b3   :  { %3068 = vrcp.f32 %v2475_v60 }
 0x9c0   :  { %v3069_v21 = vpop.eup %3068 }
 0x9c1   :  { %v2477_v35 = vmul.f32 %v3069_v21, %v2472_v1 }
 0x9c3   :  { %2482 = vrot.lane.b32.xlu0 %v2477_v35, %s3258_s18  ;;  %2479 = vrot.lane.b32.xlu1 %v2477_v35, %s3259_s19 }
 0xa35   :  { %v2483_v3 = vpop.permute.xlu0 %2482  ;;  %v2480_v4 = vpop.permute.xlu1 %2479 }
 0xa36   :  { %v2485_v7 = vsel %vm1866_vm15, %v2480_v4, %v2483_v3 }
 0xa37   :  { %v2486_v8 = vsel %vm3618_vm3, %v2485_v7, %v2477_v35 }
 0xa38   :  { %2488 = vrot.lane.b32.xlu1 %v2486_v8, %s3261_s21 }
 0xa3c   :  { %2491 = vrot.lane.b32.xlu1 %v2486_v8, %s3260_s20 }
 0xaaa   :  { %v2489_v9 = vpop.permute.xlu1 %2488 }
 0xaae   :  { %v2492_v13 = vpop.permute.xlu1 %2491 }
 0xaaf   :  { %v2494_v63 = vsel %vm1876_vm11, %v2489_v9, %v2492_v13 }
 0xab0   :  { %v2495_v15 = vsel %vm3628_vm5, %v2494_v63, %v2486_v8 }
 0xab1   :  { %2500 = vrot.lane.b32.xlu1 %v2495_v15, %s3255_s16  ;;  %2497 = vrot.lane.b32.xlu0 %v2495_v15, %s3256_s17 }
 0xb23   :  { %v2501_v16 = vpop.permute.xlu1 %2500  ;;  %v2498_v25 = vpop.permute.xlu0 %2497 }
 0xb24   :  { %v2503_v26 = vsel %vm1814_vm6, %v2498_v25, %v2501_v16 }
 0xb25   :  { %v2504_v45 = vsel %vm3638_vm7, %v2503_v26, %v2495_v15 }
 0xb26   :  { %3026 = vmatmul.mubr.msk.f32.vlgmr.msra.gmra.mxu1 %vm1819_vm8, %v2504_v45 }
 0xbe6   :  { %v2574_v17 = vpop.f32.mrf.mxu1 }
 0xbe7   :  { %3037 = vmatmul.mubr.msk.f32.vlgmr.msra.gmra.mxu0 %vm154_vm0, %v2574_v17 }
 0xbe8   :  { %v3027_v18 = vpop.f32.mrf.mxu1 }
 0xca7   :  { %v3038_v14 = vpop.f32.mrf.mxu0 }
 0xca8   :  { %v2667_v24 = vadd.f32 %v3038_v14, %v2700_v6 }
 0xca9   :  { %v2661_v19 = vpop.f32.mrf.mxu0 }
 0xcaa   :  { %2672 = vst.msk [vmem:[#allocation14 + $0x8] sm:$0xff] %vm154_vm0, %v2667_v24  ;;  %v2662_v20 = vadd.f32 %v2700_v6, %v2661_v19 }
 0xcac   :  { %2670 = vst.msk [vmem:[#allocation14] sm:$0xff] %vm154_vm0, %v2662_v20 }
 0xcad   :  { %3221 = shalt.err (!%p3218_p11)
}
 0xcae   :  { %2684 = dma.vmem_to_hbm [thread:$0]  %s2679_s0, 256, %s3766_s11, [#allocation4], %s3242_s22, %s3242_s22, %s3243_s23  }
 0xcaf   :  { %3238 = dma.done.wait [#allocation4], 256  }
 0xcb0   :  { %3239 = vsyncadd [#allocation4], 4294967040 }
 0xcb1   :  { %2688 = vsyncpa [#allocation3], 1 }
 0xcb2   :  { %2689 = vsyncpa [#allocation6], 1 }
 0xcb3   :  { %2690 = vsyncpa [#allocation9], 1 }
 0xcb4   :  { %2691 = vsyncpa [#allocation12], 1 }
 0xcb5   :  { %2692 = vsyncpa [#allocation4], 1 }

</bundles_post_ra>
